<compile_context>
chip_gen: v6e
topology: v6e:2x2x1
jax: 0.10.0
libtpu: 0.0.40
codegen_flags: <defaults>
</compile_context>

<pallas_src>
import jax
import jax.numpy as jnp
from jax.experimental import pallas as pl
from jax.experimental.pallas import tpu as pltpu

LATENT_SIZE = 1024
NUM_ACTIONS = 64
DYN_HIDDEN = 256
RWD_HIDDEN = 64
RWD_LANES = 128                      # reward hidden padded to a full lane tile
FUSED_COLS = DYN_HIDDEN + RWD_LANES  # 384
ROW_ALIGN = 16                       # bf16 sublane packing (also a multiple of 8)


def _round_up(x, m):
    return ((x + m - 1) // m) * m


def _batch_tiling(B, tb_max):
    """Near-equal batch tiles; >= 2 grid steps once B >= 32 (v7x megacore)."""
    n_steps = max(pl.cdiv(B, tb_max), 2 if B >= 2 * ROW_ALIGN else 1)
    tb = _round_up(pl.cdiv(B, n_steps), ROW_ALIGN)
    n_steps = pl.cdiv(B, tb)
    return tb, n_steps * tb, n_steps


def _world_model_kernel(s_ref, a_ref,
                        w1f_ref, w1a_ref, b1f_ref,
                        w2_ref, b2_ref,
                        wr2_ref, br2_ref,
                        s_next_ref, r_ref):
    s = s_ref[...]          # (TB, LATENT_SIZE)  compute dtype (bf16 or f32)
    a = a_ref[...]          # (TB, NUM_ACTIONS)

    # Fused layer 1: columns [0:256] = dynamics layer 1, [256:384] = reward
    # layer 1 (the reward part of w1a / b1f is zero-padded, so `a` has no
    # effect on it).  Accumulation in f32.
    pre = (jnp.dot(s, w1f_ref[...], preferred_element_type=jnp.float32)
           + jnp.dot(a, w1a_ref[...], preferred_element_type=jnp.float32)
           + b1f_ref[...])
    act = jnp.maximum(pre, 0.0)                 # (TB, 384) f32
    h = act[:, :DYN_HIDDEN]                     # (TB, 256)  dynamics hidden
    r1 = act[:, DYN_HIDDEN:]                    # (TB, 128)  reward hidden (padded)

    # dynamics layer 2 (MXU), f32 accumulation.
    s_next = (jnp.dot(h.astype(w2_ref.dtype), w2_ref[...],
                      preferred_element_type=jnp.float32) + b2_ref[...])
    s_next_ref[...] = s_next.astype(s_next_ref.dtype)

    # reward layer 2: VPU multiply + XLU lane reduction (padded lanes are zero
    # in both r1 and wr2, so they contribute nothing).
    red = jnp.sum(r1 * wr2_ref[...], axis=-1, keepdims=True) + br2_ref[...]  # (TB, 1)
    r_ref[...] = red.astype(r_ref.dtype)


def prepare_fused_params(params, compute_dtype=jnp.bfloat16):
    """Build kernel-ready fused/padded weights ONCE (hoisted off the hot path).

    Big matmul weights go to `compute_dtype`; biases and the reward-output row
    stay f32 so bias add / reward reduce happen in f32.
    """
    (w1s, w1a, b1, w2, b2, wr1, br1, wr2, br2) = params
    wr1p = jnp.pad(wr1, ((0, 0), (0, RWD_LANES - RWD_HIDDEN)))        # (1024, 128)
    w1f = jnp.concatenate([w1s, wr1p], axis=1).astype(compute_dtype)  # (1024, 384)
    w1a_f = jnp.pad(w1a, ((0, 0), (0, RWD_LANES))).astype(compute_dtype)  # (64, 384)
    br1p = jnp.pad(br1, ((0, 0), (0, RWD_LANES - RWD_HIDDEN)))        # (1, 128)
    b1f = jnp.concatenate([b1, br1p], axis=1).astype(jnp.float32)     # (1, 384)
    wr2row = jnp.pad(wr2.T, ((0, 0), (0, RWD_LANES - RWD_HIDDEN))).astype(jnp.float32)
    return (w1f, w1a_f, b1f,
            w2.astype(compute_dtype), b2.astype(jnp.float32),
            wr2row, br2.astype(jnp.float32))


def world_model_forward(s_t, a_onehot, fused_params):
    """Pallas implementation of SimpleWorldModel.forward.

    Returns (s_tp1_pred (B, 1024) f32, r_pred (B,) f32).
    """
    w1f, w1a_f, b1f, w2, b2, wr2row, br2 = fused_params
    cdt = w1f.dtype
    B = s_t.shape[0]

    tb_max = 512 if cdt == jnp.bfloat16 else 256
    TB, Bp, n_steps = _batch_tiling(B, tb_max)
    pad = Bp - B
    s_p = jnp.pad(s_t, ((0, pad), (0, 0))).astype(cdt)
    a_p = jnp.pad(a_onehot, ((0, pad), (0, 0))).astype(cdt)

    weight_spec = lambda shape: pl.BlockSpec(shape, lambda i: (0, 0))

    s_next, r = pl.pallas_call(
        _world_model_kernel,
        out_shape=(
            jax.ShapeDtypeStruct((Bp, LATENT_SIZE), jnp.float32),
            jax.ShapeDtypeStruct((Bp, 1), jnp.float32),
        ),
        grid_spec=pltpu.PrefetchScalarGridSpec(
            num_scalar_prefetch=0,
            grid=(n_steps,),
            in_specs=[
                pl.BlockSpec((TB, LATENT_SIZE), lambda i: (i, 0)),   # s_t
                pl.BlockSpec((TB, NUM_ACTIONS), lambda i: (i, 0)),   # a_onehot
                weight_spec((LATENT_SIZE, FUSED_COLS)),              # w1f (fused)
                weight_spec((NUM_ACTIONS, FUSED_COLS)),              # w1a (padded)
                weight_spec((1, FUSED_COLS)),                        # b1f (fused)
                weight_spec((DYN_HIDDEN, LATENT_SIZE)),              # w2
                weight_spec((1, LATENT_SIZE)),                       # b2
                weight_spec((1, RWD_LANES)),                         # wr2 row (padded)
                weight_spec((1, 1)),                                 # br2
            ],
            out_specs=[
                pl.BlockSpec((TB, LATENT_SIZE), lambda i: (i, 0)),
                pl.BlockSpec((TB, 1), lambda i: (i, 0)),
            ],
        ),
        compiler_params=pltpu.CompilerParams(
            dimension_semantics=("parallel",)),
    )(s_p, a_p, w1f, w1a_f, b1f, w2, b2, wr2row, br2)

    return s_next[:B], r[:B, 0]


def init_params(key):
    """Deterministic PyTorch-style (uniform +/- 1/sqrt(fan_in)) init, f32."""
    ks = jax.random.split(key, 8)

    def lin(kw, kb, fan_in, fan_out):
        bound = 1.0 / jnp.sqrt(float(fan_in))
        w = jax.random.uniform(kw, (fan_in, fan_out), jnp.float32, -bound, bound)
        b = jax.random.uniform(kb, (1, fan_out), jnp.float32, -bound, bound)
        return w, b

    # dynamics Linear(1088, 256): split weight rows into s-part and a-part.
    w1, b1 = lin(ks[0], ks[1], LATENT_SIZE + NUM_ACTIONS, DYN_HIDDEN)
    w1s, w1a = w1[:LATENT_SIZE], w1[LATENT_SIZE:]
    # dynamics Linear(256, 1024)  (see TODO(synk) above)
    w2, b2 = lin(ks[2], ks[3], DYN_HIDDEN, LATENT_SIZE)
    # reward_head Linear(1024, 64), Linear(64, 1)
    wr1, br1 = lin(ks[4], ks[5], LATENT_SIZE, RWD_HIDDEN)
    wr2, br2 = lin(ks[6], ks[7], RWD_HIDDEN, 1)
    return (w1s, w1a, b1, w2, b2, wr1, br1, wr2, br2)


def reference_forward(s_t, a_onehot, params):
    """Pure-JAX f32 reference mirroring the PyTorch forward."""
    (w1s, w1a, b1, w2, b2, wr1, br1, wr2, br2) = params
    x = jnp.concatenate([s_t, a_onehot], axis=-1)
    w1 = jnp.concatenate([w1s, w1a], axis=0)
    h = jnp.maximum(x @ w1 + b1, 0.0)
    s_tp1 = h @ w2 + b2
    r = jnp.maximum(s_t @ wr1 + br1, 0.0) @ wr2 + br2
    return s_tp1, r[:, 0]


def _check(fwd, fused, params, B, key, atol, rtol):
    k_s, k_a = jax.random.split(key)
    s_t = jax.random.normal(k_s, (B, LATENT_SIZE), jnp.float32)
    actions = jax.random.randint(k_a, (B,), 0, NUM_ACTIONS)
    a_onehot = jax.nn.one_hot(actions, NUM_ACTIONS, dtype=jnp.float32)

    s_pred, r_pred = fwd(s_t, a_onehot, fused)
    jax.block_until_ready((s_pred, r_pred))

    s_ref, r_ref = reference_forward(s_t, a_onehot, params)
    assert s_pred.shape == (B, LATENT_SIZE)
    assert r_pred.shape == (B,)
    assert jnp.allclose(s_pred, s_ref, atol=atol, rtol=rtol), "s_next mismatch"
    assert jnp.allclose(r_pred, r_ref, atol=atol, rtol=rtol), "reward mismatch"


if __name__ == "__main__":
    key = jax.random.PRNGKey(0)
    k_p, k1, k2, k3 = jax.random.split(key, 4)
    params = init_params(k_p)

    # Weight fusion is done once, off the per-call hot path.
    fused_bf16 = jax.block_until_ready(prepare_fused_params(params, jnp.bfloat16))
    fused_f32 = jax.block_until_ready(prepare_fused_params(params, jnp.float32))

    fwd = jax.jit(world_model_forward)

    # Default bf16-MXU path: single-step grid (B=2) and 2-step parallel grid (B=48).
    _check(fwd, fused_bf16, params, B=2, key=k1, atol=3e-2, rtol=3e-2)
    _check(fwd, fused_bf16, params, B=48, key=k2, atol=3e-2, rtol=3e-2)
    # f32 exact-parity path.
    _check(fwd, fused_f32, params, B=8, key=k3, atol=1e-3, rtol=1e-3)

    print("KERNEL_OK")
</pallas_src>

<mosaic_0001>
module attributes {stable_mosaic.version = 11 : i64} {
  func.func @_world_model_kernel(%arg0: i32, %arg1: memref<16x1024xbf16, #tpu.memory_space<vmem>>, %arg2: memref<16x64xbf16, #tpu.memory_space<vmem>>, %arg3: memref<1024x384xbf16, #tpu.memory_space<vmem>>, %arg4: memref<64x384xbf16, #tpu.memory_space<vmem>>, %arg5: memref<1x384xf32, #tpu.memory_space<vmem>>, %arg6: memref<256x1024xbf16, #tpu.memory_space<vmem>>, %arg7: memref<1x1024xf32, #tpu.memory_space<vmem>>, %arg8: memref<1x128xf32, #tpu.memory_space<vmem>>, %arg9: memref<1x1xf32, #tpu.memory_space<vmem>>, %arg10: memref<16x1024xf32, #tpu.memory_space<vmem>>, %arg11: memref<16x1xf32, #tpu.memory_space<vmem>>) attributes {dimension_semantics = [#tpu.dimension_semantics<parallel>], iteration_bounds = array<i64: 1>, scalar_prefetch = 0 : i64, scratch_operands = 0 : i64, tpu.core_type = #tpu.core_type<tc>, window_params = [{transform_indices = @transform_0, window_bounds = array<i64: 16, 1024>}, {transform_indices = @transform_1, window_bounds = array<i64: 16, 64>}, {pipeline_mode = #tpu.pipeline_mode<synchronous>, transform_indices = @transform_2, window_bounds = array<i64: 1024, 384>}, {pipeline_mode = #tpu.pipeline_mode<synchronous>, transform_indices = @transform_3, window_bounds = array<i64: 64, 384>}, {pipeline_mode = #tpu.pipeline_mode<synchronous>, transform_indices = @transform_4, window_bounds = array<i64: 1, 384>}, {pipeline_mode = #tpu.pipeline_mode<synchronous>, transform_indices = @transform_5, window_bounds = array<i64: 256, 1024>}, {pipeline_mode = #tpu.pipeline_mode<synchronous>, transform_indices = @transform_6, window_bounds = array<i64: 1, 1024>}, {pipeline_mode = #tpu.pipeline_mode<synchronous>, transform_indices = @transform_7, window_bounds = array<i64: 1, 128>}, {pipeline_mode = #tpu.pipeline_mode<synchronous>, transform_indices = @transform_8, window_bounds = array<i64: 1, 1>}, {transform_indices = @transform_9, window_bounds = array<i64: 16, 1024>}, {transform_indices = @transform_10, window_bounds = array<i64: 16, 1>}]} {
    %c0 = arith.constant 0 : index
    %c0_0 = arith.constant 0 : index
    %0 = vector.load %arg1[%c0, %c0_0] : memref<16x1024xbf16, #tpu.memory_space<vmem>>, vector<16x1024xbf16>
    %c0_1 = arith.constant 0 : index
    %c0_2 = arith.constant 0 : index
    %1 = vector.load %arg2[%c0_1, %c0_2] : memref<16x64xbf16, #tpu.memory_space<vmem>>, vector<16x64xbf16>
    %c0_3 = arith.constant 0 : index
    %c0_4 = arith.constant 0 : index
    %2 = vector.load %arg3[%c0_3, %c0_4] : memref<1024x384xbf16, #tpu.memory_space<vmem>>, vector<1024x384xbf16>
    %cst = arith.constant dense<0.000000e+00> : vector<16x384xf32>
    %3 = tpu.matmul %0, %2, %cst {dimension_numbers = #tpu.dot_dimension_numbers<[1], [0], [0], [1], [0, 0, 1, 1], [], []>} : vector<16x1024xbf16>, vector<1024x384xbf16>, vector<16x384xf32> -> vector<16x384xf32>
    %c0_5 = arith.constant 0 : index
    %c0_6 = arith.constant 0 : index
    %4 = vector.load %arg4[%c0_5, %c0_6] : memref<64x384xbf16, #tpu.memory_space<vmem>>, vector<64x384xbf16>
    %cst_7 = arith.constant dense<0.000000e+00> : vector<16x384xf32>
    %5 = tpu.matmul %1, %4, %cst_7 {dimension_numbers = #tpu.dot_dimension_numbers<[1], [0], [0], [1], [0, 0, 1, 1], [], []>} : vector<16x64xbf16>, vector<64x384xbf16>, vector<16x384xf32> -> vector<16x384xf32>
    %6 = arith.addf %3, %5 : vector<16x384xf32>
    %c0_8 = arith.constant 0 : index
    %c0_9 = arith.constant 0 : index
    %7 = vector.load %arg5[%c0_8, %c0_9] : memref<1x384xf32, #tpu.memory_space<vmem>>, vector<1x384xf32>
    %8 = vector.broadcast %7 : vector<1x384xf32> to vector<16x384xf32>
    %9 = arith.addf %6, %8 : vector<16x384xf32>
    %cst_10 = arith.constant 0.000000e+00 : f32
    %10 = vector.broadcast %cst_10 : f32 to vector<16x384xf32>
    %11 = arith.maximumf %9, %10 : vector<16x384xf32>
    %12 = vector.extract_strided_slice %11 {offsets = [0, 0], sizes = [16, 256], strides = [1, 1]} : vector<16x384xf32> to vector<16x256xf32>
    %13 = vector.extract_strided_slice %11 {offsets = [0, 256], sizes = [16, 128], strides = [1, 1]} : vector<16x384xf32> to vector<16x128xf32>
    %14 = arith.truncf %12 : vector<16x256xf32> to vector<16x256xbf16>
    %c0_11 = arith.constant 0 : index
    %c0_12 = arith.constant 0 : index
    %15 = vector.load %arg6[%c0_11, %c0_12] : memref<256x1024xbf16, #tpu.memory_space<vmem>>, vector<256x1024xbf16>
    %cst_13 = arith.constant dense<0.000000e+00> : vector<16x1024xf32>
    %16 = tpu.matmul %14, %15, %cst_13 {dimension_numbers = #tpu.dot_dimension_numbers<[1], [0], [0], [1], [0, 0, 1, 1], [], []>} : vector<16x256xbf16>, vector<256x1024xbf16>, vector<16x1024xf32> -> vector<16x1024xf32>
    %c0_14 = arith.constant 0 : index
    %c0_15 = arith.constant 0 : index
    %17 = vector.load %arg7[%c0_14, %c0_15] : memref<1x1024xf32, #tpu.memory_space<vmem>>, vector<1x1024xf32>
    %18 = vector.broadcast %17 : vector<1x1024xf32> to vector<16x1024xf32>
    %19 = arith.addf %16, %18 : vector<16x1024xf32>
    %c0_16 = arith.constant 0 : index
    %c0_17 = arith.constant 0 : index
    %20 = vector.load %arg10[%c0_16, %c0_17] : memref<16x1024xf32, #tpu.memory_space<vmem>>, vector<16x1024xf32>
    tpu.vector_store %arg10[%c0_16, %c0_17], %19 {strides = array<i32>} : memref<16x1024xf32, #tpu.memory_space<vmem>>, vector<16x1024xf32>,
    %c0_18 = arith.constant 0 : index
    %c0_19 = arith.constant 0 : index
    %21 = vector.load %arg8[%c0_18, %c0_19] : memref<1x128xf32, #tpu.memory_space<vmem>>, vector<1x128xf32>
    %22 = vector.broadcast %21 : vector<1x128xf32> to vector<16x128xf32>
    %23 = arith.mulf %13, %22 : vector<16x128xf32>
    %cst_20 = arith.constant dense<0.000000e+00> : vector<16xf32>
    %24 = vector.multi_reduction <add>, %23, %cst_20 [1] : vector<16x128xf32> to vector<16xf32>
    %25 = vector.shape_cast %24 : vector<16xf32> to vector<16x1xf32>
    %c0_21 = arith.constant 0 : index
    %c0_22 = arith.constant 0 : index
    %26 = vector.load %arg9[%c0_21, %c0_22] : memref<1x1xf32, #tpu.memory_space<vmem>>, vector<1x1xf32>
    %27 = vector.broadcast %26 : vector<1x1xf32> to vector<16x1xf32>
    %28 = arith.addf %25, %27 : vector<16x1xf32>
    %c0_23 = arith.constant 0 : index
    %c0_24 = arith.constant 0 : index
    %29 = vector.load %arg11[%c0_23, %c0_24] : memref<16x1xf32, #tpu.memory_space<vmem>>, vector<16x1xf32>
    tpu.vector_store %arg11[%c0_23, %c0_24], %28 {strides = array<i32>} : memref<16x1xf32, #tpu.memory_space<vmem>>, vector<16x1xf32>,
    return
  }
  func.func @transform_0(%arg0: i32) -> (i32, i32) {
    %c0_i32 = arith.constant 0 : i32
    %c0_i32_0 = arith.constant 0 : i32
    return %arg0, %c0_i32 : i32, i32
  }
  func.func @transform_1(%arg0: i32) -> (i32, i32) {
    %c0_i32 = arith.constant 0 : i32
    %c0_i32_0 = arith.constant 0 : i32
    return %arg0, %c0_i32 : i32, i32
  }
  func.func @transform_2(%arg0: i32) -> (i32, i32) {
    %c0_i32 = arith.constant 0 : i32
    %c0_i32_0 = arith.constant 0 : i32
    %c0_i32_1 = arith.constant 0 : i32
    return %c0_i32, %c0_i32_0 : i32, i32
  }
  func.func @transform_3(%arg0: i32) -> (i32, i32) {
    %c0_i32 = arith.constant 0 : i32
    %c0_i32_0 = arith.constant 0 : i32
    %c0_i32_1 = arith.constant 0 : i32
    return %c0_i32, %c0_i32_0 : i32, i32
  }
  func.func @transform_4(%arg0: i32) -> (i32, i32) {
    %c0_i32 = arith.constant 0 : i32
    %c0_i32_0 = arith.constant 0 : i32
    %c0_i32_1 = arith.constant 0 : i32
    return %c0_i32, %c0_i32_0 : i32, i32
  }
  func.func @transform_5(%arg0: i32) -> (i32, i32) {
    %c0_i32 = arith.constant 0 : i32
    %c0_i32_0 = arith.constant 0 : i32
    %c0_i32_1 = arith.constant 0 : i32
    return %c0_i32, %c0_i32_0 : i32, i32
  }
  func.func @transform_6(%arg0: i32) -> (i32, i32) {
    %c0_i32 = arith.constant 0 : i32
    %c0_i32_0 = arith.constant 0 : i32
    %c0_i32_1 = arith.constant 0 : i32
    return %c0_i32, %c0_i32_0 : i32, i32
  }
  func.func @transform_7(%arg0: i32) -> (i32, i32) {
    %c0_i32 = arith.constant 0 : i32
    %c0_i32_0 = arith.constant 0 : i32
    %c0_i32_1 = arith.constant 0 : i32
    return %c0_i32, %c0_i32_0 : i32, i32
  }
  func.func @transform_8(%arg0: i32) -> (i32, i32) {
    %c0_i32 = arith.constant 0 : i32
    %c0_i32_0 = arith.constant 0 : i32
    %c0_i32_1 = arith.constant 0 : i32
    return %c0_i32, %c0_i32_0 : i32, i32
  }
  func.func @transform_9(%arg0: i32) -> (i32, i32) {
    %c0_i32 = arith.constant 0 : i32
    %c0_i32_0 = arith.constant 0 : i32
    return %arg0, %c0_i32 : i32, i32
  }
  func.func @transform_10(%arg0: i32) -> (i32, i32) {
    %c0_i32 = arith.constant 0 : i32
    %c0_i32_0 = arith.constant 0 : i32
    return %arg0, %c0_i32 : i32, i32
  }
}

</mosaic_0001>

<bundles_post_ra>
// kernel: world_model_forward.1
= control target key start
LH: loop header
LB: loop body
LE: loop exit
PB: predicated region body
PF: predicated region fallthrough
CT: control target
= control target key end

     0   :  { %s4048_s0 = inlined_call_operand.vmem [shape: bf16[16,1024], index: 0, kind: input, shape index: {}]   ;;  %s4049_s1 = inlined_call_operand.vmem [shape: bf16[16,64], index: 1, kind: input, shape index: {}]   ;;  %s4050_s2 = inlined_call_operand.hbm [shape: bf16[1024,384], index: 2, kind: input, shape index: {}]   ;;  %s4051_s3 = inlined_call_operand.vmem [shape: bf16[64,384], index: 3, kind: input, shape index: {}]   ;;  %s4052_s4 = inlined_call_operand.vmem [shape: f32[1,384], index: 4, kind: input, shape index: {}]   ;;  %s4053_s5 = inlined_call_operand.hbm [shape: bf16[256,1024], index: 5, kind: input, shape index: {}]   ;;  %s4054_s6 = inlined_call_operand.vmem [shape: f32[1,1024], index: 6, kind: input, shape index: {}]   ;;  %s4055_s7 = inlined_call_operand.vmem [shape: f32[1,128], index: 7, kind: input, shape index: {}]   ;;  %s4056_s8 = inlined_call_operand.<no memory space> [shape: f32[1,1], index: 8, kind: input, shape index: {}]   ;;  %s4057_s9 = inlined_call_operand.vmem [shape: f32[16,1024], index: 9, kind: output, shape index: {0}]   ;;  %s4058_s10 = inlined_call_operand.vmem [shape: f32[16,1], index: 10, kind: output, shape index: {1}]  }
   0x1   :  { %v16_v0 = vstv %s4056_s8 }
   0x2   :  { %17 = vst [vmem:[#allocation2] sm:$0x1] %v16_v0 }
   0x3   :  { %18 = vsyncpa [#allocation4], 0 }
   0x4   :  { %19 = vsyncpa [#allocation6], 0  ;;  %s3744_s15 = smov [#allocation3]  }
   0x5   :  { %s29_s16 = sshll.u32 %s3744_s15, 4  ;;  %s30_s16 = int_to_ptr.vmem [resolvable:$true] %s29_s16 }
   0x6   :  { %s3708_s17 = scalar_lea.vmem %s30_s16, 24576  ;;  %p3713_p1 = scmp.lt.s32.totalorder %s30_s16, %s30_s16 }
   0x7   :  { %p3709_p0 = scmp.ne.s32.totalorder %s30_s16, %s3708_s17  ;;  %p3714_p2 = scmp.lt.s32.totalorder %s3708_s17, %s3708_s17 }
   0x9   :  { %p3715_p3 = por %p3714_p2, %p3713_p1 }
   0xb   :  { %p3716_p4 = pnand %p3715_p3, %p3709_p0 }
   0xd   :  { %3719 = shalt.err (!%p3716_p4)
}
   0xe   :  { %s3745_s18 = smov 192   ;;  %s3746_s19 = smov 12  }
   0xf   :  { %35 = dma.hbm_to_vmem [thread:$0]  %s4050_s2, 24576, %s30_s16, [#allocation4], %s3745_s18, %s3745_s18, %s3746_s19  }
  0x10   :  { %s3747_s8 = smov [#allocation5]  }
  0x11   :  { %s45_s22 = sshll.u32 %s3747_s8, 4  ;;  %s46_s22 = int_to_ptr.vmem [resolvable:$true] %s45_s22 }
  0x12   :  { %s3728_s23 = scalar_lea.vmem %s46_s22, 16384  ;;  %p3733_p6 = scmp.lt.s32.totalorder %s46_s22, %s46_s22 }
  0x13   :  { %p3729_p5 = scmp.ne.s32.totalorder %s46_s22, %s3728_s23  ;;  %p3734_p7 = scmp.lt.s32.totalorder %s3728_s23, %s3728_s23 }
  0x15   :  { %p3735_p8 = por %p3734_p7, %p3733_p6 }
  0x17   :  { %p3736_p9 = pnand %p3735_p8, %p3729_p5 }
  0x19   :  { %3739 = shalt.err (!%p3736_p9)
}
  0x1a   :  { %s3748_s24 = smov 512   ;;  %s3749_s25 = smov 32  }
  0x1b   :  { %51 = dma.hbm_to_vmem [thread:$0]  %s4053_s5, 16384, %s46_s22, [#allocation6], %s3748_s24, %s3748_s24, %s3749_s25  }
  0x1c   :  { %3740 = dma.done.wait [#allocation4], 24576  }
  0x1d   :  { %3741 = vsyncadd [#allocation4], 4294942720 }
  0x1e   :  { %3742 = dma.done.wait [#allocation6], 16384  }
  0x1f   :  { %3743 = vsyncadd [#allocation6], 4294950912  ;;  %v3750_v1 = vmov 0.0   ;;  %vm3751_vm0 = vmmov 0   ;;  %v3752_v2 = vmov 0   ;;  %v3443_v17 = vld [vmem:[%s4049_s1] sm:$0xff]  }
  0x20   :  { %3406 = vmatprep.subr.bf16.mxu1 %v3750_v1  ;;  %3414 = vmatprep.mubr.msk.bf16.mxu1 %vm3751_vm0, %v3750_v1  ;;  %v3427_v3 = vld [vmem:[%s4051_s3 + $0x4c] ss:$12 sps:$4 sm:$0xff]   ;;  %v3429_v4 = vld [vmem:[%s4051_s3 + $0x50] ss:$12 sps:$4 sm:$0xff]   ;;  %v3430_v5 = vld [vmem:[%s4051_s3 + $0x48] ss:$12 sps:$4 sm:$0xff]  }
  0x21   :  { %452 = vmatprep.mubr.bf16.mxu0 %v3752_v2  ;;  %428 = vmatprep.subr.bf16.mxu0 %v3427_v3  ;;  %v3431_v6 = vld [vmem:[%s4051_s3 + $0x34] ss:$12 sps:$4 sm:$0xff]   ;;  %v3433_v7 = vld [vmem:[%s4051_s3 + $0x38] ss:$12 sps:$4 sm:$0xff]   ;;  %v3434_v8 = vld [vmem:[%s4051_s3 + $0x30] ss:$12 sps:$4 sm:$0xff]  }
  0x22   :  { %3407 = vmatpush3.bf16.msra.mxu1 %v3429_v4  ;;  %429 = vmatpush1.bf16.msra.mxu0 %v3430_v5  ;;  %v3435_v9 = vld [vmem:[%s4051_s3 + $0x1c] ss:$12 sps:$4 sm:$0xff]   ;;  %v3437_v10 = vld [vmem:[%s4051_s3 + $0x20] ss:$12 sps:$4 sm:$0xff]   ;;  %v3438_v11 = vld [vmem:[%s4051_s3 + $0x18] ss:$12 sps:$4 sm:$0xff]  }
  0x23   :  { %3408 = vmatprep.subr.bf16.mxu1 %v3750_v1  ;;  %430 = vmatprep.subr.bf16.mxu0 %v3431_v6  ;;  %v3439_v12 = vld [vmem:[%s4051_s3 + $0x4] ss:$12 sps:$4 sm:$0xff]   ;;  %v3441_v13 = vld [vmem:[%s4051_s3 + $0x8] ss:$12 sps:$4 sm:$0xff]   ;;  %v3442_v14 = vld [vmem:[%s4051_s3] ss:$12 sps:$4 sm:$0xff]  }
  0x24   :  { %v3446_v15 = vld [vmem:[#allocation3 + $0x22c] ss:$12 sps:$4 sm:$0xff]   ;;  %vm416_vm1 = vcmask 523264   ;;  %v3444_v18 = vld [vmem:[#allocation3 + $0x228] ss:$12 sps:$4 sm:$0xff]   ;;  %v65_v60 = vld [vmem:[%s4048_s0] sm:$0xff] }
  0x25   :  { %v3449_v16 = vld [vmem:[#allocation3 + $0xac] ss:$12 sps:$4 sm:$0xff]   ;;  %v3447_v19 = vld [vmem:[#allocation3 + $0xa8] ss:$12 sps:$4 sm:$0xff]   ;;  %v3450_v22 = vld [vmem:[#allocation3 + $0x210] ss:$12 sps:$4 sm:$0xff]  }
  0x26   :  { %3409 = vmatpush3.bf16.msra.mxu1 %v3433_v7  ;;  %431 = vmatpush1.bf16.msra.mxu0 %v3434_v8  ;;  %v3452_v20 = vld [vmem:[#allocation3 + $0x214] ss:$12 sps:$4 sm:$0xff]   ;;  %v3453_v23 = vld [vmem:[#allocation3 + $0x90] ss:$12 sps:$4 sm:$0xff]   ;;  %v3456_v26 = vld [vmem:[#allocation3 + $0x1f8] ss:$12 sps:$4 sm:$0xff]  }
  0x27   :  { %3410 = vmatprep.subr.bf16.mxu1 %v3750_v1  ;;  %432 = vmatprep.subr.bf16.mxu0 %v3435_v9  ;;  %v3455_v21 = vld [vmem:[#allocation3 + $0x94] ss:$12 sps:$4 sm:$0xff]   ;;  %v3458_v24 = vld [vmem:[#allocation3 + $0x1fc] ss:$12 sps:$4 sm:$0xff]   ;;  %v3459_v27 = vld [vmem:[#allocation3 + $0x78] ss:$12 sps:$4 sm:$0xff]  }
  0x28   :  { %v3461_v25 = vld [vmem:[#allocation3 + $0x7c] ss:$12 sps:$4 sm:$0xff]   ;;  %v3464_v28 = vld [vmem:[#allocation3 + $0x1e4] ss:$12 sps:$4 sm:$0xff]   ;;  %v3462_v30 = vld [vmem:[#allocation3 + $0x1e0] ss:$12 sps:$4 sm:$0xff]  }
  0x29   :  { %v3467_v29 = vld [vmem:[#allocation3 + $0x64] ss:$12 sps:$4 sm:$0xff]   ;;  %v3465_v31 = vld [vmem:[#allocation3 + $0x60] ss:$12 sps:$4 sm:$0xff]   ;;  %v3468_v34 = vld [vmem:[#allocation3 + $0x1c8] ss:$12 sps:$4 sm:$0xff]  }
  0x2a   :  { %3411 = vmatpush3.bf16.msra.mxu1 %v3437_v10  ;;  %433 = vmatpush1.bf16.msra.mxu0 %v3438_v11  ;;  %v3470_v32 = vld [vmem:[#allocation3 + $0x1cc] ss:$12 sps:$4 sm:$0xff]   ;;  %v3471_v35 = vld [vmem:[#allocation3 + $0x48] ss:$12 sps:$4 sm:$0xff]   ;;  %v3474_v38 = vld [vmem:[#allocation3 + $0x1b0] ss:$12 sps:$4 sm:$0xff]  }
  0x2b   :  { %3412 = vmatprep.subr.bf16.mxu1 %v3750_v1  ;;  %434 = vmatprep.subr.bf16.mxu0 %v3439_v12  ;;  %v3473_v33 = vld [vmem:[#allocation3 + $0x4c] ss:$12 sps:$4 sm:$0xff]   ;;  %v3476_v36 = vld [vmem:[#allocation3 + $0x1b4] ss:$12 sps:$4 sm:$0xff]   ;;  %v3477_v39 = vld [vmem:[#allocation3 + $0x30] ss:$12 sps:$4 sm:$0xff]  }
  0x2c   :  { %v3479_v37 = vld [vmem:[#allocation3 + $0x34] ss:$12 sps:$4 sm:$0xff]   ;;  %v3482_v40 = vld [vmem:[#allocation3 + $0x19c] ss:$12 sps:$4 sm:$0xff]   ;;  %v3480_v42 = vld [vmem:[#allocation3 + $0x198] ss:$12 sps:$4 sm:$0xff]  }
  0x2d   :  { %v3485_v41 = vld [vmem:[#allocation3 + $0x1c] ss:$12 sps:$4 sm:$0xff]   ;;  %v3483_v43 = vld [vmem:[#allocation3 + $0x18] ss:$12 sps:$4 sm:$0xff]   ;;  %v3486_v46 = vld [vmem:[#allocation3 + $0x180] ss:$12 sps:$4 sm:$0xff]  }
  0x2e   :  { %3413 = vmatpush3.bf16.msra.mxu1 %v3441_v13  ;;  %435 = vmatpush1.bf16.msra.mxu0 %v3442_v14  ;;  %v3488_v44 = vld [vmem:[#allocation3 + $0x184] ss:$12 sps:$4 sm:$0xff]   ;;  %v3489_v47 = vld [vmem:[#allocation3] ss:$12 sps:$4 sm:$0xff]   ;;  %v3492_v50 = vld [vmem:[#allocation3 + $0x2e8] ss:$12 sps:$4 sm:$0xff]  }
  0x2f   :  { %1611 = vmatprep.subr.bf16.mxu1 %v3446_v15  ;;  %1568 = vmatprep.subr.bf16.mxu0 %v3449_v16  ;;  %v3491_v45 = vld [vmem:[#allocation3 + $0x4] ss:$12 sps:$4 sm:$0xff]   ;;  %v3494_v48 = vld [vmem:[#allocation3 + $0x2ec] ss:$12 sps:$4 sm:$0xff]   ;;  %v3495_v51 = vld [vmem:[#allocation3 + $0x168] ss:$12 sps:$4 sm:$0xff]  }
  0x30   :  { %v3497_v49 = vld [vmem:[#allocation3 + $0x16c] ss:$12 sps:$4 sm:$0xff]   ;;  %v3500_v52 = vld [vmem:[#allocation3 + $0x2d4] ss:$12 sps:$4 sm:$0xff]   ;;  %v3498_v54 = vld [vmem:[#allocation3 + $0x2d0] ss:$12 sps:$4 sm:$0xff]  }
  0x31   :  { %3415 = vmatmul.mubr.msk.bf16.vlgmr.msra.gmra.mxu1 %vm416_vm1, %v3443_v17  ;;  %2981 = vmatmul.mubr.msk.bf16.vlgmr.msra.gmra.mxu0 %vm416_vm1, %v3443_v17  ;;  %v3503_v53 = vld [vmem:[#allocation3 + $0x154] ss:$12 sps:$4 sm:$0xff]   ;;  %v3501_v55 = vld [vmem:[#allocation3 + $0x150] ss:$12 sps:$4 sm:$0xff]   ;;  %v66_v58 = vld [vmem:[%s4048_s0 + $0x8] sm:$0xff]  ;;  %vm2955_vm2 = vcmask 7168  }
  0x32   :  { %1612 = vmatpush1.bf16.msra.mxu1 %v3444_v18  ;;  %1569 = vmatpush1.bf16.msra.mxu0 %v3447_v19  ;;  %v3506_v56 = vld [vmem:[#allocation3 + $0x2bc] ss:$12 sps:$4 sm:$0xff]   ;;  %v3504_v63 = vld [vmem:[#allocation3 + $0x2b8] ss:$12 sps:$4 sm:$0xff]   ;;  %v3510_v4 = vld [vmem:[#allocation3 + $0x2a0] ss:$12 sps:$4 sm:$0xff]  }
  0x33   :  { %1613 = vmatprep.subr.bf16.mxu1 %v3452_v20  ;;  %1570 = vmatprep.subr.bf16.mxu0 %v3455_v21  ;;  %v3509_v57 = vld [vmem:[#allocation3 + $0x13c] ss:$12 sps:$4 sm:$0xff]   ;;  %v3507_v1 = vld [vmem:[#allocation3 + $0x138] ss:$12 sps:$4 sm:$0xff]   ;;  %v3513_v5 = vld [vmem:[#allocation3 + $0x120] ss:$12 sps:$4 sm:$0xff]  }
  0x34   :  { %v70_v59 = vld [vmem:[%s4048_s0 + $0x28] sm:$0xff]  ;;  %v69_v62 = vld [vmem:[%s4048_s0 + $0x20] sm:$0xff] }
  0x35   :  { %v3865_v61 = vcombine.high %v66_v58, %v70_v59  ;;  %v3870_v0 = vcombine.high %v65_v60, %v69_v62  ;;  %v3512_v2 = vld [vmem:[#allocation3 + $0x2a4] ss:$12 sps:$4 sm:$0xff]   ;;  %v3518_v6 = vld [vmem:[#allocation3 + $0x28c] ss:$12 sps:$4 sm:$0xff]   ;;  %v3516_v8 = vld [vmem:[#allocation3 + $0x288] ss:$12 sps:$4 sm:$0xff]  }
  0x36   :  { %1614 = vmatpush1.bf16.msra.mxu1 %v3450_v22  ;;  %1571 = vmatpush1.bf16.msra.mxu0 %v3453_v23  ;;  %v3515_v3 = vld [vmem:[#allocation3 + $0x124] ss:$12 sps:$4 sm:$0xff]   ;;  %v3521_v7 = vld [vmem:[#allocation3 + $0x10c] ss:$12 sps:$4 sm:$0xff]   ;;  %v3519_v9 = vld [vmem:[#allocation3 + $0x108] ss:$12 sps:$4 sm:$0xff]  }
  0x37   :  { %1615 = vmatprep.subr.bf16.mxu1 %v3458_v24  ;;  %1572 = vmatprep.subr.bf16.mxu0 %v3461_v25  ;;  %v3524_v10 = vld [vmem:[#allocation3 + $0x274] ss:$12 sps:$4 sm:$0xff]   ;;  %v3522_v12 = vld [vmem:[#allocation3 + $0x270] ss:$12 sps:$4 sm:$0xff]   ;;  %v3528_v16 = vld [vmem:[#allocation3 + $0x258] ss:$12 sps:$4 sm:$0xff]   ;;  %v3874_v24 = vcombine.low %v66_v58, %v70_v59  ;;  %v3876_v25 = vcombine.low %v65_v60, %v69_v62 }
  0x38   :  { %1643 = vmatprep.mubr.bf16.mxu1 %v3865_v61  ;;  %1600 = vmatprep.mubr.bf16.mxu0 %v3870_v0  ;;  %v3527_v11 = vld [vmem:[#allocation3 + $0xf4] ss:$12 sps:$4 sm:$0xff]   ;;  %v3525_v13 = vld [vmem:[#allocation3 + $0xf0] ss:$12 sps:$4 sm:$0xff]   ;;  %v3531_v17 = vld [vmem:[#allocation3 + $0xd8] ss:$12 sps:$4 sm:$0xff]  }
  0x39   :  { %v3530_v14 = vld [vmem:[#allocation3 + $0x25c] ss:$12 sps:$4 sm:$0xff]   ;;  %v3536_v18 = vld [vmem:[#allocation3 + $0x244] ss:$12 sps:$4 sm:$0xff]   ;;  %v3534_v20 = vld [vmem:[#allocation3 + $0x240] ss:$12 sps:$4 sm:$0xff]  }
  0x3a   :  { %1616 = vmatpush1.bf16.msra.mxu1 %v3456_v26  ;;  %1573 = vmatpush1.bf16.msra.mxu0 %v3459_v27  ;;  %v3533_v15 = vld [vmem:[#allocation3 + $0xdc] ss:$12 sps:$4 sm:$0xff]   ;;  %v3539_v19 = vld [vmem:[#allocation3 + $0xc4] ss:$12 sps:$4 sm:$0xff]   ;;  %v3537_v21 = vld [vmem:[#allocation3 + $0xc0] ss:$12 sps:$4 sm:$0xff]  }
  0x3b   :  { %1617 = vmatprep.subr.bf16.mxu1 %v3464_v28  ;;  %1574 = vmatprep.subr.bf16.mxu0 %v3467_v29  ;;  %v3542_v22 = vld [vmem:[#allocation3 + $0x52c] ss:$12 sps:$4 sm:$0xff]   ;;  %v3540_v26 = vld [vmem:[#allocation3 + $0x528] ss:$12 sps:$4 sm:$0xff]   ;;  %v3584_v58 = vld [vmem:[#allocation3 + $0x484] ss:$12 sps:$4 sm:$0xff]  }
  0x3c   :  { %v3545_v23 = vld [vmem:[#allocation3 + $0x3ac] ss:$12 sps:$4 sm:$0xff]   ;;  %v3543_v27 = vld [vmem:[#allocation3 + $0x3a8] ss:$12 sps:$4 sm:$0xff]   ;;  %v3587_v59 = vld [vmem:[#allocation3 + $0x304] ss:$12 sps:$4 sm:$0xff]  }
  0x3d   :  { %v3548_v28 = vld [vmem:[#allocation3 + $0x514] ss:$12 sps:$4 sm:$0xff]  }
  0x3e   :  { %1618 = vmatpush1.bf16.msra.mxu1 %v3462_v30  ;;  %1575 = vmatpush1.bf16.msra.mxu0 %v3465_v31  ;;  %v3551_v29 = vld [vmem:[#allocation3 + $0x394] ss:$12 sps:$4 sm:$0xff]   ;;  %v3546_v30 = vld [vmem:[#allocation3 + $0x510] ss:$12 sps:$4 sm:$0xff]  }
  0x3f   :  { %1619 = vmatprep.subr.bf16.mxu1 %v3470_v32  ;;  %1576 = vmatprep.subr.bf16.mxu0 %v3473_v33  ;;  %v3549_v31 = vld [vmem:[#allocation3 + $0x390] ss:$12 sps:$4 sm:$0xff]   ;;  %v3582_v60 = vld [vmem:[#allocation3 + $0x480] ss:$12 sps:$4 sm:$0xff]  }
  0x40   :  { %v3554_v32 = vld [vmem:[#allocation3 + $0x4fc] ss:$12 sps:$4 sm:$0xff]   ;;  %v3585_v62 = vld [vmem:[#allocation3 + $0x300] ss:$12 sps:$4 sm:$0xff]  }
  0x41   :  { %v3557_v33 = vld [vmem:[#allocation3 + $0x37c] ss:$12 sps:$4 sm:$0xff]  }
  0x42   :  { %1620 = vmatpush1.bf16.msra.mxu1 %v3468_v34  ;;  %1577 = vmatpush1.bf16.msra.mxu0 %v3471_v35  ;;  %v3552_v34 = vld [vmem:[#allocation3 + $0x4f8] ss:$12 sps:$4 sm:$0xff]  }
  0x43   :  { %1621 = vmatprep.subr.bf16.mxu1 %v3476_v36  ;;  %1578 = vmatprep.subr.bf16.mxu0 %v3479_v37  ;;  %v3555_v35 = vld [vmem:[#allocation3 + $0x378] ss:$12 sps:$4 sm:$0xff]  }
  0x44   :  { %v3560_v36 = vld [vmem:[#allocation3 + $0x4e4] ss:$12 sps:$4 sm:$0xff]  }
  0x45   :  { %v3563_v37 = vld [vmem:[#allocation3 + $0x364] ss:$12 sps:$4 sm:$0xff]  }
  0x46   :  { %1622 = vmatpush1.bf16.msra.mxu1 %v3474_v38  ;;  %1579 = vmatpush1.bf16.msra.mxu0 %v3477_v39  ;;  %v3558_v38 = vld [vmem:[#allocation3 + $0x4e0] ss:$12 sps:$4 sm:$0xff]  }
  0x47   :  { %1623 = vmatprep.subr.bf16.mxu1 %v3482_v40  ;;  %1580 = vmatprep.subr.bf16.mxu0 %v3485_v41  ;;  %v3561_v39 = vld [vmem:[#allocation3 + $0x360] ss:$12 sps:$4 sm:$0xff]  }
  0x48   :  { %v3566_v40 = vld [vmem:[#allocation3 + $0x4cc] ss:$12 sps:$4 sm:$0xff]  }
  0x49   :  { %v3569_v41 = vld [vmem:[#allocation3 + $0x34c] ss:$12 sps:$4 sm:$0xff]  }
  0x4a   :  { %1624 = vmatpush1.bf16.msra.mxu1 %v3480_v42  ;;  %1581 = vmatpush1.bf16.msra.mxu0 %v3483_v43  ;;  %v3564_v42 = vld [vmem:[#allocation3 + $0x4c8] ss:$12 sps:$4 sm:$0xff]  }
  0x4b   :  { %1625 = vmatprep.subr.bf16.mxu1 %v3488_v44  ;;  %1582 = vmatprep.subr.bf16.mxu0 %v3491_v45  ;;  %v3567_v43 = vld [vmem:[#allocation3 + $0x348] ss:$12 sps:$4 sm:$0xff]  }
  0x4c   :  { %v3572_v44 = vld [vmem:[#allocation3 + $0x4b4] ss:$12 sps:$4 sm:$0xff]  }
  0x4d   :  { %v3575_v45 = vld [vmem:[#allocation3 + $0x334] ss:$12 sps:$4 sm:$0xff]  }
  0x4e   :  { %1626 = vmatpush1.bf16.msra.mxu1 %v3486_v46  ;;  %1583 = vmatpush1.bf16.msra.mxu0 %v3489_v47  ;;  %v3570_v46 = vld [vmem:[#allocation3 + $0x4b0] ss:$12 sps:$4 sm:$0xff]  }
  0x4f   :  { %1627 = vmatprep.subr.bf16.mxu1 %v3494_v48  ;;  %1584 = vmatprep.subr.bf16.mxu0 %v3497_v49  ;;  %v3883_v47 = vld [vmem:[%s4048_s0 + $0x18] sm:$0xff]  ;;  %v3893_v49 = vld [vmem:[%s4048_s0 + $0x10] sm:$0xff] }
  0x50   :  { %v3888_v48 = vld [vmem:[%s4048_s0 + $0x38] sm:$0xff] }
  0x52   :  { %1628 = vmatpush2.bf16.msra.mxu1 %v3492_v50  ;;  %1585 = vmatpush2.bf16.msra.mxu0 %v3495_v51  ;;  %v3897_v50 = vcombine.high %v3883_v47, %v3888_v48  ;;  %v3902_v51 = vld [vmem:[%s4048_s0 + $0x30] sm:$0xff] }
  0x53   :  { %1629 = vmatprep.subr.bf16.mxu1 %v3500_v52  ;;  %1586 = vmatprep.subr.bf16.mxu0 %v3503_v53  ;;  %v3573_v52 = vld [vmem:[#allocation3 + $0x330] ss:$12 sps:$4 sm:$0xff]   ;;  %v3906_v53 = vcombine.high %v3893_v49, %v3902_v51 }
  0x56   :  { %1630 = vmatpush2.bf16.msra.mxu1 %v3498_v54  ;;  %1587 = vmatpush2.bf16.msra.mxu0 %v3501_v55  ;;  %v3578_v54 = vld [vmem:[#allocation3 + $0x49c] ss:$12 sps:$4 sm:$0xff]  }
  0x57   :  { %1631 = vmatprep.subr.bf16.mxu1 %v3506_v56  ;;  %1588 = vmatprep.subr.bf16.mxu0 %v3509_v57  ;;  %v3581_v55 = vld [vmem:[#allocation3 + $0x31c] ss:$12 sps:$4 sm:$0xff]   ;;  %v3576_v56 = vld [vmem:[#allocation3 + $0x498] ss:$12 sps:$4 sm:$0xff]  }
  0x58   :  { %v3579_v57 = vld [vmem:[#allocation3 + $0x318] ss:$12 sps:$4 sm:$0xff]  }
  0x5a   :  { %1632 = vmatpush2.bf16.msra.mxu1 %v3504_v63  ;;  %1589 = vmatpush2.bf16.msra.mxu0 %v3507_v1  ;;  %v3590_v63 = vld [vmem:[#allocation3 + $0x5ec] ss:$12 sps:$4 sm:$0xff]  }
  0x5b   :  { %1633 = vmatprep.subr.bf16.mxu1 %v3512_v2  ;;  %1590 = vmatprep.subr.bf16.mxu0 %v3515_v3  ;;  %v3593_v1 = vld [vmem:[#allocation3 + $0x46c] ss:$12 sps:$4 sm:$0xff]   ;;  %v3588_v2 = vld [vmem:[#allocation3 + $0x5e8] ss:$12 sps:$4 sm:$0xff]  }
  0x5c   :  { %v3591_v3 = vld [vmem:[#allocation3 + $0x468] ss:$12 sps:$4 sm:$0xff]  }
  0x5e   :  { %1634 = vmatpush2.bf16.msra.mxu1 %v3510_v4  ;;  %1591 = vmatpush2.bf16.msra.mxu0 %v3513_v5  ;;  %v3596_v4 = vld [vmem:[#allocation3 + $0x5d4] ss:$12 sps:$4 sm:$0xff]  }
  0x5f   :  { %1635 = vmatprep.subr.bf16.mxu1 %v3518_v6  ;;  %1592 = vmatprep.subr.bf16.mxu0 %v3521_v7  ;;  %v3599_v5 = vld [vmem:[#allocation3 + $0x454] ss:$12 sps:$4 sm:$0xff]   ;;  %v3594_v6 = vld [vmem:[#allocation3 + $0x5d0] ss:$12 sps:$4 sm:$0xff]  }
  0x60   :  { %v3597_v7 = vld [vmem:[#allocation3 + $0x450] ss:$12 sps:$4 sm:$0xff]  }
  0x62   :  { %1636 = vmatpush2.bf16.msra.mxu1 %v3516_v8  ;;  %1593 = vmatpush2.bf16.msra.mxu0 %v3519_v9  ;;  %v3602_v8 = vld [vmem:[#allocation3 + $0x5bc] ss:$12 sps:$4 sm:$0xff]  }
  0x63   :  { %1637 = vmatprep.subr.bf16.mxu1 %v3524_v10  ;;  %1594 = vmatprep.subr.bf16.mxu0 %v3527_v11  ;;  %v3605_v9 = vld [vmem:[#allocation3 + $0x43c] ss:$12 sps:$4 sm:$0xff]   ;;  %v3600_v10 = vld [vmem:[#allocation3 + $0x5b8] ss:$12 sps:$4 sm:$0xff]  }
  0x64   :  { %v3603_v11 = vld [vmem:[#allocation3 + $0x438] ss:$12 sps:$4 sm:$0xff]  }
  0x66   :  { %1638 = vmatpush2.bf16.msra.mxu1 %v3522_v12  ;;  %1595 = vmatpush2.bf16.msra.mxu0 %v3525_v13  ;;  %v3608_v12 = vld [vmem:[#allocation3 + $0x5a4] ss:$12 sps:$4 sm:$0xff]  }
  0x67   :  { %1639 = vmatprep.subr.bf16.mxu1 %v3530_v14  ;;  %1596 = vmatprep.subr.bf16.mxu0 %v3533_v15  ;;  %v3611_v13 = vld [vmem:[#allocation3 + $0x424] ss:$12 sps:$4 sm:$0xff]   ;;  %v3606_v14 = vld [vmem:[#allocation3 + $0x5a0] ss:$12 sps:$4 sm:$0xff]  }
  0x68   :  { %v3609_v15 = vld [vmem:[#allocation3 + $0x420] ss:$12 sps:$4 sm:$0xff]  }
  0x6a   :  { %1640 = vmatpush2.bf16.msra.mxu1 %v3528_v16  ;;  %1597 = vmatpush2.bf16.msra.mxu0 %v3531_v17  ;;  %v3614_v16 = vld [vmem:[#allocation3 + $0x58c] ss:$12 sps:$4 sm:$0xff]  }
  0x6b   :  { %1641 = vmatprep.subr.bf16.mxu1 %v3536_v18  ;;  %1598 = vmatprep.subr.bf16.mxu0 %v3539_v19  ;;  %v3617_v17 = vld [vmem:[#allocation3 + $0x40c] ss:$12 sps:$4 sm:$0xff]   ;;  %v3612_v18 = vld [vmem:[#allocation3 + $0x588] ss:$12 sps:$4 sm:$0xff]  }
  0x6c   :  { %v3615_v19 = vld [vmem:[#allocation3 + $0x408] ss:$12 sps:$4 sm:$0xff]  }
  0x6e   :  { %1642 = vmatpush2.bf16.msra.mxu1 %v3534_v20  ;;  %1599 = vmatpush2.bf16.msra.mxu0 %v3537_v21  ;;  %v3620_v20 = vld [vmem:[#allocation3 + $0x574] ss:$12 sps:$4 sm:$0xff]  }
  0x6f   :  { %1697 = vmatprep.subr.bf16.mxu1 %v3542_v22  ;;  %1654 = vmatprep.subr.bf16.mxu0 %v3545_v23  ;;  %v3623_v21 = vld [vmem:[#allocation3 + $0x3f4] ss:$12 sps:$4 sm:$0xff]   ;;  %v3618_v22 = vld [vmem:[#allocation3 + $0x570] ss:$12 sps:$4 sm:$0xff]  }
  0x70   :  { %v3621_v23 = vld [vmem:[#allocation3 + $0x3f0] ss:$12 sps:$4 sm:$0xff]  }
  0x71   :  { %1644 = vmatmul.mubr.bf16.vlgmr.msra.gmra.mxu1 %v3874_v24  ;;  %1601 = vmatmul.mubr.bf16.vlgmr.msra.gmra.mxu0 %v3876_v25 }
  0x72   :  { %1698 = vmatpush1.bf16.msra.mxu1 %v3540_v26  ;;  %1655 = vmatpush1.bf16.msra.mxu0 %v3543_v27  ;;  %v3626_v26 = vld [vmem:[#allocation3 + $0x55c] ss:$12 sps:$4 sm:$0xff]  }
  0x73   :  { %1699 = vmatprep.subr.bf16.mxu1 %v3548_v28  ;;  %1656 = vmatprep.subr.bf16.mxu0 %v3551_v29  ;;  %v3629_v27 = vld [vmem:[#allocation3 + $0x3dc] ss:$12 sps:$4 sm:$0xff]   ;;  %v3624_v28 = vld [vmem:[#allocation3 + $0x558] ss:$12 sps:$4 sm:$0xff]  }
  0x74   :  { %1729 = vmatprep.mubr.bf16.mxu1 %v3897_v50  ;;  %1686 = vmatprep.mubr.bf16.mxu0 %v3906_v53  ;;  %v3627_v29 = vld [vmem:[#allocation3 + $0x3d8] ss:$12 sps:$4 sm:$0xff]  }
  0x76   :  { %1700 = vmatpush1.bf16.msra.mxu1 %v3546_v30  ;;  %1657 = vmatpush1.bf16.msra.mxu0 %v3549_v31  ;;  %v3632_v30 = vld [vmem:[#allocation3 + $0x544] ss:$12 sps:$4 sm:$0xff]  }
  0x77   :  { %1701 = vmatprep.subr.bf16.mxu1 %v3554_v32  ;;  %1658 = vmatprep.subr.bf16.mxu0 %v3557_v33  ;;  %v3635_v31 = vld [vmem:[#allocation3 + $0x3c4] ss:$12 sps:$4 sm:$0xff]   ;;  %v3630_v32 = vld [vmem:[#allocation3 + $0x540] ss:$12 sps:$4 sm:$0xff]  }
  0x78   :  { %v3633_v33 = vld [vmem:[#allocation3 + $0x3c0] ss:$12 sps:$4 sm:$0xff]  }
  0x7a   :  { %1702 = vmatpush1.bf16.msra.mxu1 %v3552_v34  ;;  %1659 = vmatpush1.bf16.msra.mxu0 %v3555_v35  ;;  %v3638_v34 = vld [vmem:[#allocation3 + $0x2f0] ss:$12 sps:$4 sm:$0xff]  }
  0x7b   :  { %1703 = vmatprep.subr.bf16.mxu1 %v3560_v36  ;;  %1660 = vmatprep.subr.bf16.mxu0 %v3563_v37  ;;  %v3636_v35 = vld [vmem:[#allocation3 + $0x170] ss:$12 sps:$4 sm:$0xff]   ;;  %v3912_v36 = vcombine.low %v3883_v47, %v3888_v48  ;;  %v3647_v47 = vld [vmem:[#allocation3 + $0x200] ss:$12 sps:$4 sm:$0xff]   ;;  %v3650_v48 = vld [vmem:[#allocation3 + $0x2a8] ss:$12 sps:$4 sm:$0xff]  }
  0x7c   :  { %v3637_v37 = vld [vmem:[#allocation3 + $0xb0] ss:$12 sps:$4 sm:$0xff]  }
  0x7e   :  { %1704 = vmatpush1.bf16.msra.mxu1 %v3558_v38  ;;  %1661 = vmatpush1.bf16.msra.mxu0 %v3561_v39  ;;  %v3916_v38 = vcombine.low %v3893_v49, %v3902_v51  ;;  %v3639_v39 = vld [vmem:[#allocation3 + $0x230] ss:$12 sps:$4 sm:$0xff]   ;;  %v3648_v49 = vld [vmem:[#allocation3 + $0x128] ss:$12 sps:$4 sm:$0xff]  }
  0x7f   :  { %1705 = vmatprep.subr.bf16.mxu1 %v3566_v40  ;;  %1662 = vmatprep.subr.bf16.mxu0 %v3569_v41  ;;  %v3642_v40 = vld [vmem:[#allocation3 + $0x2d8] ss:$12 sps:$4 sm:$0xff]   ;;  %v3649_v51 = vld [vmem:[#allocation3 + $0x68] ss:$12 sps:$4 sm:$0xff]  }
  0x80   :  { %v3640_v41 = vld [vmem:[#allocation3 + $0x158] ss:$12 sps:$4 sm:$0xff]  }
  0x82   :  { %1706 = vmatpush1.bf16.msra.mxu1 %v3564_v42  ;;  %1663 = vmatpush1.bf16.msra.mxu0 %v3567_v43  ;;  %v3641_v42 = vld [vmem:[#allocation3 + $0x98] ss:$12 sps:$4 sm:$0xff]  }
  0x83   :  { %1707 = vmatprep.subr.bf16.mxu1 %v3572_v44  ;;  %1664 = vmatprep.subr.bf16.mxu0 %v3575_v45  ;;  %v3643_v43 = vld [vmem:[#allocation3 + $0x218] ss:$12 sps:$4 sm:$0xff]   ;;  %v3646_v44 = vld [vmem:[#allocation3 + $0x2c0] ss:$12 sps:$4 sm:$0xff]  }
  0x84   :  { %v3644_v45 = vld [vmem:[#allocation3 + $0x140] ss:$12 sps:$4 sm:$0xff]  }
  0x86   :  { %1708 = vmatpush1.bf16.msra.mxu1 %v3570_v46  ;;  %1665 = vmatpush1.bf16.msra.mxu0 %v3573_v52  ;;  %v3645_v46 = vld [vmem:[#allocation3 + $0x80] ss:$12 sps:$4 sm:$0xff]   ;;  %v3651_v52 = vld [vmem:[#allocation3 + $0x1e8] ss:$12 sps:$4 sm:$0xff]  }
  0x87   :  { %1709 = vmatprep.subr.bf16.mxu1 %v3578_v54  ;;  %1666 = vmatprep.subr.bf16.mxu0 %v3581_v55  ;;  %v3654_v54 = vld [vmem:[#allocation3 + $0x290] ss:$12 sps:$4 sm:$0xff]  }
  0x88   :  { %v3652_v55 = vld [vmem:[#allocation3 + $0x110] ss:$12 sps:$4 sm:$0xff]  }
  0x8a   :  { %1710 = vmatpush1.bf16.msra.mxu1 %v3576_v56  ;;  %1667 = vmatpush1.bf16.msra.mxu0 %v3579_v57  ;;  %v3653_v56 = vld [vmem:[#allocation3 + $0x50] ss:$12 sps:$4 sm:$0xff]   ;;  %v3656_v57 = vld [vmem:[#allocation3 + $0xf8] ss:$12 sps:$4 sm:$0xff]  }
  0x8b   :  { %1711 = vmatprep.subr.bf16.mxu1 %v3584_v58  ;;  %1668 = vmatprep.subr.bf16.mxu0 %v3587_v59  ;;  %v3659_v58 = vld [vmem:[#allocation3 + $0x1b8] ss:$12 sps:$4 sm:$0xff]  }
  0x8c   :  { %v3657_v59 = vld [vmem:[#allocation3 + $0x38] ss:$12 sps:$4 sm:$0xff]  }
  0x8e   :  { %1712 = vmatpush1.bf16.msra.mxu1 %v3582_v60  ;;  %1669 = vmatpush1.bf16.msra.mxu0 %v3585_v62  ;;  %v3662_v60 = vld [vmem:[#allocation3 + $0x260] ss:$12 sps:$4 sm:$0xff]  }
  0x8f   :  { %1713 = vmatprep.subr.bf16.mxu1 %v3590_v63  ;;  %1670 = vmatprep.subr.bf16.mxu0 %v3593_v1  ;;  %v3660_v62 = vld [vmem:[#allocation3 + $0xe0] ss:$12 sps:$4 sm:$0xff]  }
  0x90   :  { %v3663_v63 = vld [vmem:[#allocation3 + $0x1a0] ss:$12 sps:$4 sm:$0xff]  }
  0x91   :  { %v3661_v1 = vld [vmem:[#allocation3 + $0x20] ss:$12 sps:$4 sm:$0xff]  }
  0x92   :  { %1714 = vmatpush2.bf16.msra.mxu1 %v3588_v2  ;;  %1671 = vmatpush2.bf16.msra.mxu0 %v3591_v3  ;;  %v3666_v2 = vld [vmem:[#allocation3 + $0x248] ss:$12 sps:$4 sm:$0xff]  }
  0x93   :  { %1715 = vmatprep.subr.bf16.mxu1 %v3596_v4  ;;  %1672 = vmatprep.subr.bf16.mxu0 %v3599_v5  ;;  %v3664_v3 = vld [vmem:[#allocation3 + $0xc8] ss:$12 sps:$4 sm:$0xff]  }
  0x94   :  { %v3667_v4 = vld [vmem:[#allocation3 + $0x188] ss:$12 sps:$4 sm:$0xff]  }
  0x95   :  { %v3665_v5 = vld [vmem:[#allocation3 + $0x8] ss:$12 sps:$4 sm:$0xff]  }
  0x96   :  { %1716 = vmatpush2.bf16.msra.mxu1 %v3594_v6  ;;  %1673 = vmatpush2.bf16.msra.mxu0 %v3597_v7  ;;  %v3670_v6 = vld [vmem:[#allocation3 + $0x5f0] ss:$12 sps:$4 sm:$0xff]  }
  0x97   :  { %1717 = vmatprep.subr.bf16.mxu1 %v3602_v8  ;;  %1674 = vmatprep.subr.bf16.mxu0 %v3605_v9  ;;  %v3668_v7 = vld [vmem:[#allocation3 + $0x470] ss:$12 sps:$4 sm:$0xff]  }
  0x98   :  { %v3671_v8 = vld [vmem:[#allocation3 + $0x530] ss:$12 sps:$4 sm:$0xff]  }
  0x99   :  { %v3669_v9 = vld [vmem:[#allocation3 + $0x3b0] ss:$12 sps:$4 sm:$0xff]  }
  0x9a   :  { %1718 = vmatpush2.bf16.msra.mxu1 %v3600_v10  ;;  %1675 = vmatpush2.bf16.msra.mxu0 %v3603_v11  ;;  %v3674_v10 = vld [vmem:[#allocation3 + $0x5d8] ss:$12 sps:$4 sm:$0xff]  }
  0x9b   :  { %1719 = vmatprep.subr.bf16.mxu1 %v3608_v12  ;;  %1676 = vmatprep.subr.bf16.mxu0 %v3611_v13  ;;  %v3672_v11 = vld [vmem:[#allocation3 + $0x458] ss:$12 sps:$4 sm:$0xff]  }
  0x9c   :  { %v3675_v12 = vld [vmem:[#allocation3 + $0x518] ss:$12 sps:$4 sm:$0xff]  }
  0x9d   :  { %v3673_v13 = vld [vmem:[#allocation3 + $0x398] ss:$12 sps:$4 sm:$0xff]  }
  0x9e   :  { %1720 = vmatpush2.bf16.msra.mxu1 %v3606_v14  ;;  %1677 = vmatpush2.bf16.msra.mxu0 %v3609_v15  ;;  %v3678_v14 = vld [vmem:[#allocation3 + $0x5c0] ss:$12 sps:$4 sm:$0xff]  }
  0x9f   :  { %1721 = vmatprep.subr.bf16.mxu1 %v3614_v16  ;;  %1678 = vmatprep.subr.bf16.mxu0 %v3617_v17  ;;  %v3676_v15 = vld [vmem:[#allocation3 + $0x440] ss:$12 sps:$4 sm:$0xff]  }
  0xa0   :  { %v3679_v16 = vld [vmem:[#allocation3 + $0x500] ss:$12 sps:$4 sm:$0xff]  }
  0xa1   :  { %v3677_v17 = vld [vmem:[#allocation3 + $0x380] ss:$12 sps:$4 sm:$0xff]  }
  0xa2   :  { %1722 = vmatpush2.bf16.msra.mxu1 %v3612_v18  ;;  %1679 = vmatpush2.bf16.msra.mxu0 %v3615_v19  ;;  %v3683_v18 = vld [vmem:[#allocation3 + $0x4e8] ss:$12 sps:$4 sm:$0xff]  }
  0xa3   :  { %1723 = vmatprep.subr.bf16.mxu1 %v3620_v20  ;;  %1680 = vmatprep.subr.bf16.mxu0 %v3623_v21  ;;  %v3681_v19 = vld [vmem:[#allocation3 + $0x368] ss:$12 sps:$4 sm:$0xff]   ;;  %v3686_v20 = vld [vmem:[#allocation3 + $0x590] ss:$12 sps:$4 sm:$0xff]  }
  0xa4   :  { %v3684_v21 = vld [vmem:[#allocation3 + $0x410] ss:$12 sps:$4 sm:$0xff]  }
  0xa6   :  { %1724 = vmatpush2.bf16.msra.mxu1 %v3618_v22  ;;  %1681 = vmatpush2.bf16.msra.mxu0 %v3621_v23  ;;  %v3690_v22 = vld [vmem:[#allocation3 + $0x578] ss:$12 sps:$4 sm:$0xff]  }
  0xa7   :  { %1725 = vmatprep.subr.bf16.mxu1 %v3626_v26  ;;  %1682 = vmatprep.subr.bf16.mxu0 %v3629_v27  ;;  %v3688_v23 = vld [vmem:[#allocation3 + $0x3f8] ss:$12 sps:$4 sm:$0xff]  }
  0xa8   :  { %v3691_v26 = vld [vmem:[#allocation3 + $0x4b8] ss:$12 sps:$4 sm:$0xff]  }
  0xa9   :  { %v3689_v27 = vld [vmem:[#allocation3 + $0x338] ss:$12 sps:$4 sm:$0xff]  }
  0xaa   :  { %1726 = vmatpush2.bf16.msra.mxu1 %v3624_v28  ;;  %1683 = vmatpush2.bf16.msra.mxu0 %v3627_v29  ;;  %v3694_v28 = vld [vmem:[#allocation3 + $0x560] ss:$12 sps:$4 sm:$0xff]  }
  0xab   :  { %1727 = vmatprep.subr.bf16.mxu1 %v3632_v30  ;;  %1684 = vmatprep.subr.bf16.mxu0 %v3635_v31  ;;  %v3692_v29 = vld [vmem:[#allocation3 + $0x3e0] ss:$12 sps:$4 sm:$0xff]  }
  0xac   :  { %v3695_v30 = vld [vmem:[#allocation3 + $0x4a0] ss:$12 sps:$4 sm:$0xff]  }
  0xad   :  { %v3693_v31 = vld [vmem:[#allocation3 + $0x320] ss:$12 sps:$4 sm:$0xff]  }
  0xae   :  { %1728 = vmatpush2.bf16.msra.mxu1 %v3630_v32  ;;  %1685 = vmatpush2.bf16.msra.mxu0 %v3633_v33  ;;  %v3698_v32 = vld [vmem:[#allocation3 + $0x548] ss:$12 sps:$4 sm:$0xff]  }
  0xaf   :  { %3340 = vmatprep.subr.bf16.mxu1 %v3638_v34  ;;  %3318 = vmatprep.subr.bf16.mxu0 %v3636_v35  ;;  %v3696_v33 = vld [vmem:[#allocation3 + $0x3c8] ss:$12 sps:$4 sm:$0xff]  }
  0xb0   :  { %v1992_v34 = vld [vmem:[#allocation5 + $0x1c8] sm:$0xff] }
  0xb1   :  { %1730 = vmatmul.mubr.bf16.vlgmr.msra.gmra.mxu1 %v3912_v36  ;;  %1687 = vmatmul.mubr.bf16.vlgmr.msra.gmra.mxu0 %v3916_v38  ;;  %v1996_v35 = vld [vmem:[#allocation5 + $0x1e8] sm:$0xff] }
  0xb2   :  { %3341 = vmatpush3.bf16.msra.mxu1 %v3639_v39  ;;  %3319 = vmatpush3.bf16.msra.mxu0 %v3637_v37  ;;  %v1991_v37 = vld [vmem:[#allocation5 + $0x1c0] sm:$0xff] }
  0xb3   :  { %3342 = vmatprep.subr.bf16.mxu1 %v3642_v40  ;;  %3320 = vmatprep.subr.bf16.mxu0 %v3640_v41  ;;  %v1995_v39 = vld [vmem:[#allocation5 + $0x1e0] sm:$0xff]  ;;  %v3699_v40 = vld [vmem:[#allocation3 + $0x488] ss:$12 sps:$4 sm:$0xff]  }
  0xb4   :  { %1772 = vmatprep.mubr.bf16.mxu0 %v3870_v0  ;;  %1813 = vmatprep.mubr.bf16.mxu1 %v3865_v61  ;;  %v3655_v0 = vld [vmem:[#allocation3 + $0x1d0] ss:$12 sps:$4 sm:$0xff]   ;;  %v3658_v61 = vld [vmem:[#allocation3 + $0x278] ss:$12 sps:$4 sm:$0xff]   ;;  %v3697_v41 = vld [vmem:[#allocation3 + $0x308] ss:$12 sps:$4 sm:$0xff]  }
  0xb6   :  { %3343 = vmatpush3.bf16.msra.mxu1 %v3643_v43  ;;  %3321 = vmatpush3.bf16.msra.mxu0 %v3641_v42  ;;  %v3242_v42 = vcombine.high %v1992_v34, %v1996_v35  ;;  %v3240_v43 = vcombine.high %v1991_v37, %v1995_v39 }
  0xb7   :  { %3344 = vmatprep.subr.bf16.mxu1 %v3646_v44  ;;  %3322 = vmatprep.subr.bf16.mxu0 %v3644_v45  ;;  %v1984_v44 = vld [vmem:[#allocation5 + $0x188] sm:$0xff] }
  0xb8   :  { %v1988_v45 = vld [vmem:[#allocation5 + $0x1a8] sm:$0xff] }
  0xba   :  { %3345 = vmatpush3.bf16.msra.mxu1 %v3647_v47  ;;  %3323 = vmatpush3.bf16.msra.mxu0 %v3645_v46  ;;  %v1983_v46 = vld [vmem:[#allocation5 + $0x180] sm:$0xff] }
  0xbb   :  { %3346 = vmatprep.subr.bf16.mxu1 %v3650_v48  ;;  %3324 = vmatprep.subr.bf16.mxu0 %v3648_v49  ;;  %v1987_v47 = vld [vmem:[#allocation5 + $0x1a0] sm:$0xff]  ;;  %v3241_v48 = vcombine.low %v1992_v34, %v1996_v35  ;;  %v3239_v49 = vcombine.low %v1991_v37, %v1995_v39  ;;  %v1936_v37 = vld [vmem:[#allocation5 + $0x8] sm:$0xff] }
  0xbc   :  { %v1940_v39 = vld [vmem:[#allocation5 + $0x28] sm:$0xff] }
  0xbe   :  { %3347 = vmatpush3.bf16.msra.mxu1 %v3651_v52  ;;  %3325 = vmatpush3.bf16.msra.mxu0 %v3649_v51  ;;  %v3234_v51 = vcombine.high %v1984_v44, %v1988_v45  ;;  %v3232_v52 = vcombine.high %v1983_v46, %v1987_v47 }
  0xbf   :  { %3348 = vmatprep.subr.bf16.mxu1 %v3654_v54  ;;  %3326 = vmatprep.subr.bf16.mxu0 %v3652_v55  ;;  %v1976_v54 = vld [vmem:[#allocation5 + $0x148] sm:$0xff] }
  0xc0   :  { %v1980_v55 = vld [vmem:[#allocation5 + $0x168] sm:$0xff] }
  0xc2   :  { %3349 = vmatpush3.bf16.msra.mxu1 %v3655_v0  ;;  %3327 = vmatpush3.bf16.msra.mxu0 %v3653_v56  ;;  %v1975_v0 = vld [vmem:[#allocation5 + $0x140] sm:$0xff] }
  0xc3   :  { %3350 = vmatprep.subr.bf16.mxu1 %v3658_v61  ;;  %3328 = vmatprep.subr.bf16.mxu0 %v3656_v57  ;;  %v1979_v61 = vld [vmem:[#allocation5 + $0x160] sm:$0xff]  ;;  %v3233_v57 = vcombine.low %v1984_v44, %v1988_v45  ;;  %v3186_v44 = vcombine.high %v1936_v37, %v1940_v39 }
  0xc6   :  { %3351 = vmatpush3.bf16.msra.mxu1 %v3659_v58  ;;  %3329 = vmatpush3.bf16.msra.mxu0 %v3657_v59  ;;  %v3231_v59 = vcombine.low %v1983_v46, %v1987_v47  ;;  %v2056_v46 = vld [vmem:[#allocation5 + $0x3c8] sm:$0xff] }
  0xc7   :  { %3352 = vmatprep.subr.bf16.mxu1 %v3662_v60  ;;  %3330 = vmatprep.subr.bf16.mxu0 %v3660_v62  ;;  %v3226_v60 = vcombine.high %v1976_v54, %v1980_v55  ;;  %v3224_v62 = vcombine.high %v1975_v0, %v1979_v61  ;;  %v2060_v47 = vld [vmem:[#allocation5 + $0x3e8] sm:$0xff] }
  0xca   :  { %3353 = vmatpush3.bf16.msra.mxu1 %v3663_v63  ;;  %3331 = vmatpush3.bf16.msra.mxu0 %v3661_v1  ;;  %v1968_v63 = vld [vmem:[#allocation5 + $0x108] sm:$0xff] }
  0xcb   :  { %3354 = vmatprep.subr.bf16.mxu1 %v3666_v2  ;;  %3332 = vmatprep.subr.bf16.mxu0 %v3664_v3  ;;  %v1972_v1 = vld [vmem:[#allocation5 + $0x128] sm:$0xff]  ;;  %v1967_v3 = vld [vmem:[#allocation5 + $0x100] sm:$0xff] }
  0xce   :  { %3355 = vmatpush3.bf16.msra.mxu1 %v3667_v4  ;;  %3333 = vmatpush3.bf16.msra.mxu0 %v3665_v5  ;;  %v1971_v4 = vld [vmem:[#allocation5 + $0x120] sm:$0xff] }
  0xcf   :  { %3384 = vmatprep.subr.bf16.mxu1 %v3670_v6  ;;  %3362 = vmatprep.subr.bf16.mxu0 %v3668_v7  ;;  %v3218_v6 = vcombine.high %v1968_v63, %v1972_v1  ;;  %v3216_v7 = vcombine.high %v1967_v3, %v1971_v4 }
  0xd1   :  { %1814 = vmatmul.mubr.bf16.vlgmr.msra.gmra.mxu1 %v3874_v24  ;;  %1773 = vmatmul.mubr.bf16.vlgmr.msra.gmra.mxu0 %v3876_v25  ;;  %v3682_v24 = vld [vmem:[#allocation3 + $0x5a8] ss:$12 sps:$4 sm:$0xff]  }
  0xd2   :  { %3385 = vmatpush3.bf16.msra.mxu1 %v3671_v8  ;;  %3363 = vmatpush3.bf16.msra.mxu0 %v3669_v9  ;;  %v3680_v25 = vld [vmem:[#allocation3 + $0x428] ss:$12 sps:$4 sm:$0xff]  }
  0xd3   :  { %3386 = vmatprep.subr.bf16.mxu1 %v3674_v10  ;;  %3364 = vmatprep.subr.bf16.mxu0 %v3672_v11  ;;  %v1960_v8 = vld [vmem:[#allocation5 + $0xc8] sm:$0xff]  ;;  %v1959_v10 = vld [vmem:[#allocation5 + $0xc0] sm:$0xff] }
  0xd4   :  { %1854 = vmatprep.mubr.bf16.mxu0 %v3906_v53  ;;  %1895 = vmatprep.mubr.bf16.mxu1 %v3897_v50  ;;  %v3687_v53 = vld [vmem:[#allocation3 + $0x4d0] ss:$12 sps:$4 sm:$0xff]   ;;  %v1964_v9 = vld [vmem:[#allocation5 + $0xe8] sm:$0xff]  ;;  %v1963_v11 = vld [vmem:[#allocation5 + $0xe0] sm:$0xff] }
  0xd5   :  { %v3685_v50 = vld [vmem:[#allocation3 + $0x350] ss:$12 sps:$4 sm:$0xff]  }
  0xd6   :  { %3387 = vmatpush3.bf16.msra.mxu1 %v3675_v12  ;;  %3365 = vmatpush3.bf16.msra.mxu0 %v3673_v13  ;;  %v3217_v12 = vcombine.low %v1968_v63, %v1972_v1  ;;  %v3215_v13 = vcombine.low %v1967_v3, %v1971_v4  ;;  %v2040_v1 = vld [vmem:[#allocation5 + $0x348] sm:$0xff]  ;;  %v2039_v4 = vld [vmem:[#allocation5 + $0x340] sm:$0xff] }
  0xd7   :  { %3388 = vmatprep.subr.bf16.mxu1 %v3678_v14  ;;  %3366 = vmatprep.subr.bf16.mxu0 %v3676_v15  ;;  %v3210_v14 = vcombine.high %v1960_v8, %v1964_v9  ;;  %v3208_v15 = vcombine.high %v1959_v10, %v1963_v11  ;;  %v2044_v3 = vld [vmem:[#allocation5 + $0x368] sm:$0xff] }
  0xda   :  { %3389 = vmatpush3.bf16.msra.mxu1 %v3679_v16  ;;  %3367 = vmatpush3.bf16.msra.mxu0 %v3677_v17  ;;  %v1952_v16 = vld [vmem:[#allocation5 + $0x88] sm:$0xff] }
  0xdb   :  { %3390 = vmatprep.subr.bf16.mxu1 %v3682_v24  ;;  %3368 = vmatprep.subr.bf16.mxu0 %v3680_v25  ;;  %v1956_v17 = vld [vmem:[#allocation5 + $0xa8] sm:$0xff]  ;;  %v1951_v24 = vld [vmem:[#allocation5 + $0x80] sm:$0xff] }
  0xdc   :  { %v1955_v25 = vld [vmem:[#allocation5 + $0xa0] sm:$0xff] }
  0xde   :  { %3391 = vmatpush3.bf16.msra.mxu1 %v3683_v18  ;;  %3369 = vmatpush3.bf16.msra.mxu0 %v3681_v19  ;;  %v3209_v18 = vcombine.low %v1960_v8, %v1964_v9  ;;  %v3207_v19 = vcombine.low %v1959_v10, %v1963_v11  ;;  %v2032_v8 = vld [vmem:[#allocation5 + $0x308] sm:$0xff]  ;;  %v2031_v10 = vld [vmem:[#allocation5 + $0x300] sm:$0xff] }
  0xdf   :  { %3392 = vmatprep.subr.bf16.mxu1 %v3686_v20  ;;  %3370 = vmatprep.subr.bf16.mxu0 %v3684_v21  ;;  %v3202_v20 = vcombine.high %v1952_v16, %v1956_v17  ;;  %v1944_v21 = vld [vmem:[#allocation5 + $0x48] sm:$0xff]  ;;  %v2035_v11 = vld [vmem:[#allocation5 + $0x320] sm:$0xff] }
  0xe0   :  { %v2036_v9 = vld [vmem:[#allocation5 + $0x328] sm:$0xff] }
  0xe2   :  { %3393 = vmatpush3.bf16.msra.mxu1 %v3687_v53  ;;  %3371 = vmatpush3.bf16.msra.mxu0 %v3685_v50  ;;  %v1948_v53 = vld [vmem:[#allocation5 + $0x68] sm:$0xff]  ;;  %v3200_v50 = vcombine.high %v1951_v24, %v1955_v25 }
  0xe3   :  { %3394 = vmatprep.subr.bf16.mxu1 %v3690_v22  ;;  %3372 = vmatprep.subr.bf16.mxu0 %v3688_v23  ;;  %v3932_v22 = vld [vmem:[#allocation5 + $0x1d0] sm:$0xff]  ;;  %v3194_v34 = vcombine.high %v1944_v21, %v1948_v53 }
  0xe4   :  { %v3934_v23 = vld [vmem:[#allocation5 + $0x1f0] sm:$0xff] }
  0xe6   :  { %3395 = vmatpush3.bf16.msra.mxu1 %v3691_v26  ;;  %3373 = vmatpush3.bf16.msra.mxu0 %v3689_v27  ;;  %v3936_v26 = vld [vmem:[#allocation5 + $0x1d8] sm:$0xff]  ;;  %v1943_v27 = vld [vmem:[#allocation5 + $0x40] sm:$0xff] }
  0xe7   :  { %3396 = vmatprep.subr.bf16.mxu1 %v3694_v28  ;;  %3374 = vmatprep.subr.bf16.mxu0 %v3692_v29  ;;  %v1947_v28 = vld [vmem:[#allocation5 + $0x60] sm:$0xff]  ;;  %v3938_v29 = vld [vmem:[#allocation5 + $0x1f8] sm:$0xff] }
  0xe8   :  { %v3192_v35 = vcombine.high %v1943_v27, %v1947_v28 }
  0xea   :  { %3397 = vmatpush3.bf16.msra.mxu1 %v3695_v30  ;;  %3375 = vmatpush3.bf16.msra.mxu0 %v3693_v31  ;;  %v3201_v30 = vcombine.low %v1952_v16, %v1956_v17  ;;  %v3243_v31 = vcombine.low %v3932_v22, %v3934_v23  ;;  %v2024_v16 = vld [vmem:[#allocation5 + $0x2c8] sm:$0xff] }
  0xeb   :  { %3398 = vmatprep.subr.bf16.mxu1 %v3698_v32  ;;  %3376 = vmatprep.subr.bf16.mxu0 %v3696_v33  ;;  %v3245_v32 = vcombine.low %v3936_v26, %v3938_v29  ;;  %v3199_v33 = vcombine.low %v1951_v24, %v1955_v25  ;;  %v2028_v17 = vld [vmem:[#allocation5 + $0x2e8] sm:$0xff]  ;;  %v2023_v24 = vld [vmem:[#allocation5 + $0x2c0] sm:$0xff] }
  0xec   :  { %v2027_v25 = vld [vmem:[#allocation5 + $0x2e0] sm:$0xff] }
  0xee   :  { %3399 = vmatpush3.bf16.msra.mxu1 %v3699_v40  ;;  %3377 = vmatpush3.bf16.msra.mxu0 %v3697_v41  ;;  %v1935_v40 = vld [vmem:[#allocation5] sm:$0xff] }
  0xef   :  { %2788 = vmatprep.subr.bf16.mxu1 %v3242_v42  ;;  %2745 = vmatprep.subr.bf16.mxu0 %v3240_v43  ;;  %v1939_v41 = vld [vmem:[#allocation5 + $0x20] sm:$0xff]  ;;  %v3193_v42 = vcombine.low %v1944_v21, %v1948_v53  ;;  %v3191_v43 = vcombine.low %v1943_v27, %v1947_v28  ;;  %v3272_v21 = vcombine.high %v2023_v24, %v2027_v25  ;;  %v2016_v53 = vld [vmem:[#allocation5 + $0x288] sm:$0xff] }
  0xf0   :  { %v3184_v45 = vcombine.high %v1935_v40, %v1939_v41  ;;  %v2015_v27 = vld [vmem:[#allocation5 + $0x280] sm:$0xff] }
  0xf1   :  { %v3926_v56 = vpop.f32.mrf.mxu1  ;;  %1896 = vmatmul.mubr.bf16.vlgmr.msra.gmra.mxu1 %v3912_v36  ;;  %1855 = vmatmul.mubr.bf16.vlgmr.msra.gmra.mxu0 %v3916_v38  ;;  %v3225_v36 = vcombine.low %v1976_v54, %v1980_v55  ;;  %v3223_v38 = vcombine.low %v1975_v0, %v1979_v61  ;;  %v3306_v54 = vcombine.high %v2056_v46, %v2060_v47  ;;  %v2048_v0 = vld [vmem:[#allocation5 + $0x388] sm:$0xff]  ;;  %v2019_v28 = vld [vmem:[#allocation5 + $0x2a0] sm:$0xff] }
  0xf2   :  { %2789 = vmatpush1.bf16.msra.mxu1 %v3241_v48  ;;  %2746 = vmatpush1.bf16.msra.mxu0 %v3239_v49  ;;  %v2055_v48 = vld [vmem:[#allocation5 + $0x3c0] sm:$0xff]  ;;  %v2052_v61 = vld [vmem:[#allocation5 + $0x3a8] sm:$0xff] }
  0xf3   :  { %v3416_v58 = vpop.f32.mrf.mxu1  ;;  %2790 = vmatprep.subr.bf16.mxu1 %v3234_v51  ;;  %2747 = vmatprep.subr.bf16.mxu0 %v3232_v52  ;;  %v2059_v49 = vld [vmem:[#allocation5 + $0x3e0] sm:$0xff]  ;;  %v3185_v51 = vcombine.low %v1936_v37, %v1940_v39  ;;  %v3183_v52 = vcombine.low %v1935_v40, %v1939_v41  ;;  %v2008_v37 = vld [vmem:[#allocation5 + $0x248] sm:$0xff] }
  0xf4   :  { %v3304_v55 = vcombine.high %v2055_v48, %v2059_v49  ;;  %v2051_v58 = vld [vmem:[#allocation5 + $0x3a0] sm:$0xff]  ;;  %v2012_v39 = vld [vmem:[#allocation5 + $0x268] sm:$0xff] }
  0xf5   :  { %v3930_v2 = vpop.f32.mrf.mxu1  ;;  %v2007_v40 = vld [vmem:[#allocation5 + $0x240] sm:$0xff] }
  0xf6   :  { %2791 = vmatpush1.bf16.msra.mxu1 %v3233_v57  ;;  %2748 = vmatpush1.bf16.msra.mxu0 %v3231_v59  ;;  %v2047_v57 = vld [vmem:[#allocation5 + $0x380] sm:$0xff]  ;;  %v3305_v59 = vcombine.low %v2056_v46, %v2060_v47  ;;  %v2000_v46 = vld [vmem:[#allocation5 + $0x208] sm:$0xff] }
  0xf7   :  { %v3417_v5 = vpop.f32.mrf.mxu1  ;;  %2792 = vmatprep.subr.bf16.mxu1 %v3226_v60  ;;  %2749 = vmatprep.subr.bf16.mxu0 %v3224_v62  ;;  %v3303_v60 = vcombine.low %v2055_v48, %v2059_v49  ;;  %v3298_v62 = vcombine.high %v2048_v0, %v2052_v61  ;;  %v3296_v63 = vcombine.high %v2047_v57, %v2051_v58  ;;  %v2011_v41 = vld [vmem:[#allocation5 + $0x260] sm:$0xff]  ;;  %v2004_v47 = vld [vmem:[#allocation5 + $0x228] sm:$0xff] }
  0xf8   :  { %v3297_v5 = vcombine.low %v2048_v0, %v2052_v61  ;;  %v1999_v48 = vld [vmem:[#allocation5 + $0x200] sm:$0xff]  ;;  %v3249_v0 = vcombine.low %v2000_v46, %v2004_v47 }
  0xf9   :  { %v2003_v49 = vld [vmem:[#allocation5 + $0x220] sm:$0xff] }
  0xfa   :  { %2793 = vmatpush1.bf16.msra.mxu1 %v3225_v36  ;;  %2750 = vmatpush1.bf16.msra.mxu0 %v3223_v38  ;;  %v2043_v36 = vld [vmem:[#allocation5 + $0x360] sm:$0xff]  ;;  %v3295_v38 = vcombine.low %v2047_v57, %v2051_v58  ;;  %v3247_v61 = vcombine.low %v1999_v48, %v2003_v49  ;;  %v3246_v57 = vcombine.high %v3936_v26, %v3938_v29 }
  0xfb   :  { %2794 = vmatprep.subr.bf16.mxu1 %v3218_v6  ;;  %2751 = vmatprep.subr.bf16.mxu0 %v3216_v7  ;;  %v3290_v6 = vcombine.high %v2040_v1, %v2044_v3  ;;  %v3288_v7 = vcombine.high %v2039_v4, %v2043_v36  ;;  %v3244_v58 = vcombine.high %v3932_v22, %v3934_v23 }
  0xfe   :  { %2795 = vmatpush1.bf16.msra.mxu1 %v3217_v12  ;;  %2752 = vmatpush1.bf16.msra.mxu0 %v3215_v13  ;;  %v3289_v12 = vcombine.low %v2040_v1, %v2044_v3  ;;  %v3287_v13 = vcombine.low %v2039_v4, %v2043_v36 }
  0xff   :  { %2796 = vmatprep.subr.bf16.mxu1 %v3210_v14  ;;  %2753 = vmatprep.subr.bf16.mxu0 %v3208_v15  ;;  %v3282_v14 = vcombine.high %v2032_v8, %v2036_v9  ;;  %v3280_v15 = vcombine.high %v2031_v10, %v2035_v11 }
 0x102   :  { %2797 = vmatpush1.bf16.msra.mxu1 %v3209_v18  ;;  %2754 = vmatpush1.bf16.msra.mxu0 %v3207_v19  ;;  %v3281_v18 = vcombine.low %v2032_v8, %v2036_v9  ;;  %v3279_v19 = vcombine.low %v2031_v10, %v2035_v11 }
 0x103   :  { %2798 = vmatprep.subr.bf16.mxu1 %v3202_v20  ;;  %2755 = vmatprep.subr.bf16.mxu0 %v3200_v50  ;;  %v3274_v20 = vcombine.high %v2024_v16, %v2028_v17  ;;  %v2020_v50 = vld [vmem:[#allocation5 + $0x2a8] sm:$0xff] }
 0x106   :  { %2799 = vmatpush1.bf16.msra.mxu1 %v3201_v30  ;;  %2756 = vmatpush1.bf16.msra.mxu0 %v3199_v33  ;;  %v3273_v30 = vcombine.low %v2024_v16, %v2028_v17  ;;  %v3271_v33 = vcombine.low %v2023_v24, %v2027_v25 }
 0x107   :  { %2800 = vmatprep.subr.bf16.mxu1 %v3194_v34  ;;  %2757 = vmatprep.subr.bf16.mxu0 %v3192_v35  ;;  %v3266_v34 = vcombine.high %v2016_v53, %v2020_v50  ;;  %v3264_v35 = vcombine.high %v2015_v27, %v2019_v28 }
 0x10a   :  { %2801 = vmatpush1.bf16.msra.mxu1 %v3193_v42  ;;  %2758 = vmatpush1.bf16.msra.mxu0 %v3191_v43  ;;  %v3265_v42 = vcombine.low %v2016_v53, %v2020_v50  ;;  %v3263_v43 = vcombine.low %v2015_v27, %v2019_v28 }
 0x10b   :  { %2802 = vmatprep.subr.bf16.mxu1 %v3186_v44  ;;  %2759 = vmatprep.subr.bf16.mxu0 %v3184_v45  ;;  %v3258_v44 = vcombine.high %v2008_v37, %v2012_v39  ;;  %v3256_v45 = vcombine.high %v2007_v40, %v2011_v41 }
 0x10e   :  { %2803 = vmatpush1.bf16.msra.mxu1 %v3185_v51  ;;  %2760 = vmatpush1.bf16.msra.mxu0 %v3183_v52  ;;  %v3257_v51 = vcombine.low %v2008_v37, %v2012_v39  ;;  %v3255_v52 = vcombine.low %v2007_v40, %v2011_v41 }
 0x10f   :  { %2804 = vmatprep.subr.bf16.mxu1 %v3306_v54  ;;  %2761 = vmatprep.subr.bf16.mxu0 %v3304_v55  ;;  %v3250_v54 = vcombine.high %v2000_v46, %v2004_v47  ;;  %v3248_v55 = vcombine.high %v1999_v48, %v2003_v49 }
 0x112   :  { %2805 = vmatpush2.bf16.msra.mxu1 %v3305_v59  ;;  %2762 = vmatpush2.bf16.msra.mxu0 %v3303_v60  ;;  %v454_v59 = vpop.f32.mrf.mxu0 }
 0x113   :  { %2806 = vmatprep.subr.bf16.mxu1 %v3298_v62  ;;  %2763 = vmatprep.subr.bf16.mxu0 %v3296_v63 }
 0x114   :  { %v456_v60 = vpop.f32.mrf.mxu0 }
 0x116   :  { %2807 = vmatpush2.bf16.msra.mxu1 %v3297_v5  ;;  %2764 = vmatpush2.bf16.msra.mxu0 %v3295_v38  ;;  %v458_v62 = vpop.f32.mrf.mxu0 }
 0x117   :  { %2808 = vmatprep.subr.bf16.mxu1 %v3290_v6  ;;  %2765 = vmatprep.subr.bf16.mxu0 %v3288_v7  ;;  %v1906_v6 = vlaneseq }
 0x118   :  { %v460_v63 = vpop.f32.mrf.mxu0 }
 0x119   :  { %v3948_v11 = vshrl.u32 %v1906_v6, 7 }
 0x11a   :  { %2809 = vmatpush2.bf16.msra.mxu1 %v3289_v12  ;;  %2766 = vmatpush2.bf16.msra.mxu0 %v3287_v13 }
 0x11b   :  { %2810 = vmatprep.subr.bf16.mxu1 %v3282_v14  ;;  %2767 = vmatprep.subr.bf16.mxu0 %v3280_v15  ;;  %v1912_v25 = vsub.s32 1, %v3948_v11 }
 0x11e   :  { %2811 = vmatpush2.bf16.msra.mxu1 %v3281_v18  ;;  %2768 = vmatpush2.bf16.msra.mxu0 %v3279_v19  ;;  %v1908_v19 = vsub.s32 0, %v3948_v11 }
 0x11f   :  { %2812 = vmatprep.subr.bf16.mxu1 %v3274_v20  ;;  %2769 = vmatprep.subr.bf16.mxu0 %v3272_v21  ;;  %v3955_v21 = vld [vmem:[%s4052_s4] sm:$0x7] }
 0x120   :  { %v1909_v39 = vrot.slane %v3955_v21, %v1908_v19 }
 0x122   :  { %2813 = vmatpush2.bf16.msra.mxu1 %v3273_v30  ;;  %2770 = vmatpush2.bf16.msra.mxu0 %v3271_v33  ;;  %v1913_v33 = vrot.slane %v3955_v21, %v1912_v25 }
 0x123   :  { %2814 = vmatprep.subr.bf16.mxu1 %v3266_v34  ;;  %2771 = vmatprep.subr.bf16.mxu0 %v3264_v35 }
 0x126   :  { %2815 = vmatpush2.bf16.msra.mxu1 %v3265_v42  ;;  %2772 = vmatpush2.bf16.msra.mxu0 %v3263_v43 }
 0x127   :  { %2816 = vmatprep.subr.bf16.mxu1 %v3258_v44  ;;  %2773 = vmatprep.subr.bf16.mxu0 %v3256_v45 }
 0x12a   :  { %2817 = vmatpush2.bf16.msra.mxu1 %v3257_v51  ;;  %2774 = vmatpush2.bf16.msra.mxu0 %v3255_v52 }
 0x12b   :  { %2818 = vmatprep.subr.bf16.mxu1 %v3250_v54  ;;  %2775 = vmatprep.subr.bf16.mxu0 %v3248_v55  ;;  %v1985_v54 = vld [vmem:[#allocation5 + $0x190] sm:$0xff] }
 0x12e   :  { %2819 = vmatpush2.bf16.msra.mxu1 %v3249_v0  ;;  %2776 = vmatpush2.bf16.msra.mxu0 %v3247_v61  ;;  %v1989_v0 = vld [vmem:[#allocation5 + $0x1b0] sm:$0xff]  ;;  %v1986_v61 = vld [vmem:[#allocation5 + $0x198] sm:$0xff] }
 0x12f   :  { %2874 = vmatprep.subr.bf16.mxu1 %v3246_v57  ;;  %2831 = vmatprep.subr.bf16.mxu0 %v3244_v58  ;;  %v1990_v57 = vld [vmem:[#allocation5 + $0x1b8] sm:$0xff] }
 0x131   :  { %v1645_v1 = vpop.f32.mrf.mxu1  ;;  %v1602_v3 = vpop.f32.mrf.mxu0 }
 0x132   :  { %v1603_v7 = vadd.f32 %v1602_v3, %v454_v59  ;;  %v1978_v3 = vld [vmem:[#allocation5 + $0x158] sm:$0xff] }
 0x133   :  { %v1647_v4 = vpop.f32.mrf.mxu1  ;;  %v1604_v36 = vpop.f32.mrf.mxu0 }
 0x134   :  { %v1605_v8 = vadd.f32 %v1604_v36, %v456_v60  ;;  %v1646_v14 = vadd.f32 %v1645_v1, %v1603_v7  ;;  %v1977_v60 = vld [vmem:[#allocation5 + $0x150] sm:$0xff]  ;;  %v3235_v36 = vcombine.low %v1985_v54, %v1989_v0 }
 0x135   :  { %v1649_v5 = vpop.f32.mrf.mxu1  ;;  %v1606_v38 = vpop.f32.mrf.mxu0  ;;  %v1981_v1 = vld [vmem:[#allocation5 + $0x170] sm:$0xff] }
 0x136   :  { %v1607_v12 = vadd.f32 %v1606_v38, %v458_v62  ;;  %v1648_v24 = vadd.f32 %v1647_v4, %v1605_v8  ;;  %v3236_v62 = vcombine.high %v1985_v54, %v1989_v0  ;;  %v1982_v4 = vld [vmem:[#allocation5 + $0x178] sm:$0xff]  ;;  %v3228_v38 = vcombine.high %v1977_v60, %v1981_v1  ;;  %v1969_v7 = vld [vmem:[#allocation5 + $0x110] sm:$0xff] }
 0x137   :  { %v1651_v9 = vpop.f32.mrf.mxu1  ;;  %v1608_v10 = vpop.f32.mrf.mxu0  ;;  %v3230_v6 = vcombine.high %v1978_v3, %v1982_v4  ;;  %v1973_v8 = vld [vmem:[#allocation5 + $0x130] sm:$0xff]  ;;  %v3227_v22 = vcombine.low %v1977_v60, %v1981_v1  ;;  %v3229_v23 = vcombine.low %v1978_v3, %v1982_v4  ;;  %v2062_v0 = vld [vmem:[#allocation5 + $0x3f8] sm:$0xff] }
 0x138   :  { %v1609_v16 = vadd.f32 %v1608_v10, %v460_v63  ;;  %v1650_v50 = vadd.f32 %v1649_v5, %v1607_v12  ;;  %v3238_v63 = vcombine.high %v1986_v61, %v1990_v57  ;;  %v3237_v5 = vcombine.low %v1986_v61, %v1990_v57  ;;  %v1974_v10 = vld [vmem:[#allocation5 + $0x138] sm:$0xff]  ;;  %v2061_v54 = vld [vmem:[#allocation5 + $0x3f0] sm:$0xff] }
 0x139   :  { %v3220_v26 = vcombine.high %v1969_v7, %v1973_v8  ;;  %v1962_v12 = vld [vmem:[#allocation5 + $0xd8] sm:$0xff] }
 0x13a   :  { %v1652_v35 = vadd.f32 %v1651_v9, %v1609_v16  ;;  %v1970_v9 = vld [vmem:[#allocation5 + $0x118] sm:$0xff] }
 0x13b   :  { %v3222_v29 = vcombine.high %v1970_v9, %v1974_v10  ;;  %v2050_v1 = vld [vmem:[#allocation5 + $0x398] sm:$0xff] }
 0x13c   :  { %v2054_v3 = vld [vmem:[#allocation5 + $0x3b8] sm:$0xff] }
 0x171   :  { %v1731_v13 = vpop.f32.mrf.mxu1  ;;  %v1688_v15 = vpop.f32.mrf.mxu0 }
 0x172   :  { %v1689_v18 = vadd.f32 %v1688_v15, %v1646_v14  ;;  %v3219_v14 = vcombine.low %v1969_v7, %v1973_v8  ;;  %v3221_v15 = vcombine.low %v1970_v9, %v1974_v10  ;;  %v2041_v7 = vld [vmem:[#allocation5 + $0x350] sm:$0xff]  ;;  %v2042_v10 = vld [vmem:[#allocation5 + $0x358] sm:$0xff] }
 0x173   :  { %v1733_v17 = vpop.f32.mrf.mxu1  ;;  %v1690_v20 = vpop.f32.mrf.mxu0  ;;  %v2045_v9 = vld [vmem:[#allocation5 + $0x370] sm:$0xff] }
 0x174   :  { %v1691_v53 = vadd.f32 %v1690_v20, %v1648_v24  ;;  %v1732_v37 = vadd.f32 %v1731_v13, %v1689_v18  ;;  %v1966_v13 = vld [vmem:[#allocation5 + $0xf8] sm:$0xff]  ;;  %v1953_v24 = vld [vmem:[#allocation5 + $0x90] sm:$0xff] }
 0x175   :  { %v1735_v27 = vpop.f32.mrf.mxu1  ;;  %v1692_v28 = vpop.f32.mrf.mxu0  ;;  %v1957_v18 = vld [vmem:[#allocation5 + $0xb0] sm:$0xff]  ;;  %v1954_v20 = vld [vmem:[#allocation5 + $0x98] sm:$0xff] }
 0x176   :  { %v1734_v30 = vadd.f32 %v1733_v17, %v1691_v53  ;;  %v1693_v34 = vadd.f32 %v1692_v28, %v1650_v50  ;;  %v1921_v47 = vadd.f32 %v1909_v39, %v1732_v37  ;;  %v3214_v17 = vcombine.high %v1962_v12, %v1966_v13  ;;  %v1958_v53 = vld [vmem:[#allocation5 + $0xb8] sm:$0xff] }
 0x177   :  { %v1694_v40 = vpop.f32.mrf.mxu0  ;;  %v1737_v43 = vpop.f32.mrf.mxu1  ;;  %v3204_v28 = vcombine.high %v1953_v24, %v1957_v18  ;;  %v1950_v37 = vld [vmem:[#allocation5 + $0x78] sm:$0xff] }
 0x178   :  { %v1736_v41 = vadd.f32 %v1735_v27, %v1693_v34  ;;  %v1695_v42 = vadd.f32 %v1694_v40, %v1652_v35  ;;  %v1922_v44 = vadd.f32 %v1913_v33, %v1734_v30  ;;  %v1927_v55 = vmax.f32 %v1921_v47, 0.0  ;;  %v1949_v34 = vld [vmem:[#allocation5 + $0x70] sm:$0xff]  ;;  %v1946_v35 = vld [vmem:[#allocation5 + $0x58] sm:$0xff] }
 0x179   :  { %v3213_v27 = vcombine.low %v1962_v12, %v1966_v13  ;;  %v3206_v30 = vcombine.high %v1954_v20, %v1958_v53  ;;  %v3205_v40 = vcombine.low %v1954_v20, %v1958_v53  ;;  %v2033_v12 = vld [vmem:[#allocation5 + $0x310] sm:$0xff] }
 0x17a   :  { %v1924_v45 = vadd.f32 %v1909_v39, %v1736_v41  ;;  %v1738_v46 = vadd.f32 %v1737_v43, %v1695_v42  ;;  %v1928_v51 = vmax.f32 %v1922_v44, 0.0  ;;  %v3203_v39 = vcombine.low %v1953_v24, %v1957_v18  ;;  %v1937_v43 = vld [vmem:[#allocation5 + $0x10] sm:$0xff] }
 0x17b   :  { %v3198_v42 = vcombine.high %v1946_v35, %v1950_v37  ;;  %v1941_v44 = vld [vmem:[#allocation5 + $0x30] sm:$0xff]  ;;  %v3291_v24 = vcombine.low %v2041_v7, %v2045_v9 }
 0x17c   :  { %v1925_v48 = vadd.f32 %v1913_v33, %v1738_v46  ;;  %v1930_v49 = vmax.f32 %v1924_v45, 0.0  ;;  %v1945_v33 = vld [vmem:[#allocation5 + $0x50] sm:$0xff]  ;;  %v1938_v45 = vld [vmem:[#allocation5 + $0x18] sm:$0xff]  ;;  %v3187_v61 = vcombine.low %v1937_v43, %v1941_v44 }
 0x17d   :  { %v3196_v41 = vcombine.high %v1945_v33, %v1949_v34  ;;  %v1942_v46 = vld [vmem:[#allocation5 + $0x38] sm:$0xff]  ;;  %v3195_v47 = vcombine.low %v1945_v33, %v1949_v34 }
 0x17e   :  { %v1931_v52 = vmax.f32 %v1925_v48, 0.0  ;;  %v3963_v59 = vpack.c.bf16 %v1930_v49, %v1927_v55  ;;  %v3197_v48 = vcombine.low %v1946_v35, %v1950_v37  ;;  %v3188_v49 = vcombine.high %v1937_v43, %v1941_v44  ;;  %v2058_v55 = vld [vmem:[#allocation5 + $0x3d8] sm:$0xff]  ;;  %v2021_v44 = vld [vmem:[#allocation5 + $0x2b0] sm:$0xff] }
 0x17f   :  { %v3189_v57 = vcombine.low %v1938_v45, %v1942_v46  ;;  %v3310_v60 = vcombine.high %v2058_v55, %v2062_v0  ;;  %v2030_v33 = vld [vmem:[#allocation5 + $0x2f8] sm:$0xff] }
 0x180   :  { %v1934_v58 = vpack.c.bf16 %v1931_v52, %v1928_v51  ;;  %v3190_v51 = vcombine.high %v1938_v45, %v1942_v46  ;;  %v2057_v52 = vld [vmem:[#allocation5 + $0x3d0] sm:$0xff]  ;;  %v2018_v45 = vld [vmem:[#allocation5 + $0x298] sm:$0xff] }
 0x181   :  { %v2022_v46 = vld [vmem:[#allocation5 + $0x2b8] sm:$0xff] }
 0x182   :  { %2777 = vmatprep.mubr.bf16.mxu0 %v1934_v58  ;;  %2820 = vmatprep.mubr.bf16.mxu1 %v1934_v58 }
 0x183   :  { %2778 = vmatmul.mubr.bf16.vlgmr.msra.gmra.mxu0 %v3963_v59  ;;  %2821 = vmatmul.mubr.bf16.vlgmr.msra.gmra.mxu1 %v3963_v59 }
 0x184   :  { %2832 = vmatpush1.bf16.msra.mxu0 %v3243_v31  ;;  %2875 = vmatpush1.bf16.msra.mxu1 %v3245_v32  ;;  %v1961_v31 = vld [vmem:[#allocation5 + $0xd0] sm:$0xff] }
 0x185   :  { %2863 = vmatprep.mubr.bf16.mxu0 %v1934_v58  ;;  %2906 = vmatprep.mubr.bf16.mxu1 %v1934_v58  ;;  %v1965_v32 = vld [vmem:[#allocation5 + $0xf0] sm:$0xff]  ;;  %v3308_v58 = vcombine.high %v2057_v52, %v2061_v54 }
 0x186   :  { %2833 = vmatprep.subr.bf16.mxu0 %v3236_v62  ;;  %2876 = vmatprep.subr.bf16.mxu1 %v3238_v63  ;;  %v3212_v16 = vcombine.high %v1961_v31, %v1965_v32  ;;  %v3211_v50 = vcombine.low %v1961_v31, %v1965_v32  ;;  %v2049_v62 = vld [vmem:[#allocation5 + $0x390] sm:$0xff]  ;;  %v3292_v31 = vcombine.high %v2041_v7, %v2045_v9 }
 0x187   :  { %v2053_v63 = vld [vmem:[#allocation5 + $0x3b0] sm:$0xff] }
 0x188   :  { %2834 = vmatpush1.bf16.msra.mxu0 %v3235_v36  ;;  %2877 = vmatpush1.bf16.msra.mxu1 %v3237_v5  ;;  %v3307_v36 = vcombine.low %v2057_v52, %v2061_v54  ;;  %v3309_v5 = vcombine.low %v2058_v55, %v2062_v0 }
 0x189   :  { %2835 = vmatprep.subr.bf16.mxu0 %v3228_v38  ;;  %2878 = vmatprep.subr.bf16.mxu1 %v3230_v6  ;;  %v3300_v38 = vcombine.high %v2049_v62, %v2053_v63  ;;  %v3302_v6 = vcombine.high %v2050_v1, %v2054_v3 }
 0x18c   :  { %2836 = vmatpush1.bf16.msra.mxu0 %v3227_v22  ;;  %2879 = vmatpush1.bf16.msra.mxu1 %v3229_v23  ;;  %v2046_v22 = vld [vmem:[#allocation5 + $0x378] sm:$0xff] }
 0x18d   :  { %2837 = vmatprep.subr.bf16.mxu0 %v3220_v26  ;;  %2880 = vmatprep.subr.bf16.mxu1 %v3222_v29  ;;  %v3299_v26 = vcombine.low %v2049_v62, %v2053_v63  ;;  %v3301_v29 = vcombine.low %v2050_v1, %v2054_v3  ;;  %v3294_v32 = vcombine.high %v2042_v10, %v2046_v22  ;;  %v2010_v62 = vld [vmem:[#allocation5 + $0x258] sm:$0xff]  ;;  %v1916_v1 = vsub.s32 2, %v3948_v11 }
 0x18e   :  { %v3293_v18 = vcombine.low %v2042_v10, %v2046_v22  ;;  %v2014_v63 = vld [vmem:[#allocation5 + $0x278] sm:$0xff] }
 0x18f   :  { %v3262_v22 = vcombine.high %v2010_v62, %v2014_v63 }
 0x190   :  { %2838 = vmatpush1.bf16.msra.mxu0 %v3219_v14  ;;  %2881 = vmatpush1.bf16.msra.mxu1 %v3221_v15  ;;  %v2037_v14 = vld [vmem:[#allocation5 + $0x330] sm:$0xff]  ;;  %v2034_v15 = vld [vmem:[#allocation5 + $0x318] sm:$0xff] }
 0x191   :  { %2839 = vmatprep.subr.bf16.mxu0 %v3212_v16  ;;  %2882 = vmatprep.subr.bf16.mxu1 %v3214_v17  ;;  %v3334_v4 = vpop.f32.mrf.mxu0  ;;  %v3356_v8 = vpop.f32.mrf.mxu1  ;;  %v2038_v16 = vld [vmem:[#allocation5 + $0x338] sm:$0xff]  ;;  %v3284_v20 = vcombine.high %v2033_v12, %v2037_v14  ;;  %v3283_v37 = vcombine.low %v2033_v12, %v2037_v14  ;;  %v1917_v12 = vrot.slane %v3955_v21, %v1916_v1 }
 0x192   :  { %v3286_v53 = vcombine.high %v2034_v15, %v2038_v16 }
 0x193   :  { %v3335_v23 = vpop.f32.mrf.mxu0  ;;  %v3357_v13 = vpop.f32.mrf.mxu1 }
 0x194   :  { %2840 = vmatpush1.bf16.msra.mxu0 %v3211_v50  ;;  %2883 = vmatpush1.bf16.msra.mxu1 %v3213_v27  ;;  %v2025_v50 = vld [vmem:[#allocation5 + $0x2d0] sm:$0xff]  ;;  %v3336_v34 = vadd.f32 %v3335_v23, %v3334_v4 }
 0x195   :  { %2841 = vmatprep.subr.bf16.mxu0 %v3204_v28  ;;  %2884 = vmatprep.subr.bf16.mxu1 %v3206_v30  ;;  %v3337_v17 = vpop.f32.mrf.mxu0  ;;  %v3359_v27 = vpop.f32.mrf.mxu1  ;;  %v2029_v28 = vld [vmem:[#allocation5 + $0x2f0] sm:$0xff]  ;;  %v2026_v30 = vld [vmem:[#allocation5 + $0x2d8] sm:$0xff] }
 0x196   :  { %v3277_v52 = vcombine.low %v2026_v30, %v2030_v33  ;;  %v2001_v23 = vld [vmem:[#allocation5 + $0x210] sm:$0xff] }
 0x197   :  { %v3338_v35 = vpop.f32.mrf.mxu0  ;;  %v3360_v43 = vpop.f32.mrf.mxu1 }
 0x198   :  { %2842 = vmatpush1.bf16.msra.mxu0 %v3203_v39  ;;  %2885 = vmatpush1.bf16.msra.mxu1 %v3205_v40  ;;  %v3285_v39 = vcombine.low %v2034_v15, %v2038_v16  ;;  %v3276_v40 = vcombine.high %v2025_v50, %v2029_v28  ;;  %v3261_v16 = vcombine.low %v2010_v62, %v2014_v63 }
 0x199   :  { %2843 = vmatprep.subr.bf16.mxu0 %v3196_v41  ;;  %2886 = vmatprep.subr.bf16.mxu1 %v3198_v42  ;;  %v3278_v41 = vcombine.high %v2026_v30, %v2030_v33  ;;  %v2017_v42 = vld [vmem:[#allocation5 + $0x290] sm:$0xff] }
 0x19a   :  { %v3268_v0 = vcombine.high %v2017_v42, %v2021_v44 }
 0x19c   :  { %2844 = vmatpush1.bf16.msra.mxu0 %v3195_v47  ;;  %2887 = vmatpush1.bf16.msra.mxu1 %v3197_v48  ;;  %v3339_v47 = vadd.f32 %v3338_v35, %v3337_v17  ;;  %v3275_v48 = vcombine.low %v2025_v50, %v2029_v28  ;;  %v3311_v28 = vld [vmem:[%s4055_s7] ss:$0 sm:$0xff] }
 0x19d   :  { %2845 = vmatprep.subr.bf16.mxu0 %v3188_v49  ;;  %2888 = vmatprep.subr.bf16.mxu1 %v3190_v51  ;;  %v1775_v49 = vadd.f32 %v3336_v34, %v3926_v56  ;;  %v3358_v51 = vadd.f32 %v3357_v13, %v3356_v8  ;;  %v3361_v56 = vadd.f32 %v3360_v43, %v3359_v27 }
 0x19e   :  { %v1778_v3 = vadd.f32 %v3339_v47, %v3930_v2  ;;  %v2002_v2 = vld [vmem:[#allocation5 + $0x218] sm:$0xff] }
 0x1a0   :  { %2846 = vmatpush1.bf16.msra.mxu0 %v3187_v61  ;;  %2889 = vmatpush1.bf16.msra.mxu1 %v3189_v57  ;;  %v3270_v61 = vcombine.high %v2018_v45, %v2022_v46  ;;  %v2009_v57 = vld [vmem:[#allocation5 + $0x250] sm:$0xff]  ;;  %v1819_v13 = vadd.f32 %v3361_v56, %v1778_v3 }
 0x1a1   :  { %2847 = vmatprep.subr.bf16.mxu0 %v3308_v58  ;;  %2890 = vmatprep.subr.bf16.mxu1 %v3310_v60  ;;  %v2013_v60 = vld [vmem:[#allocation5 + $0x270] sm:$0xff] }
 0x1a2   :  { %v3260_v10 = vcombine.high %v2009_v57, %v2013_v60  ;;  %v3259_v15 = vcombine.low %v2009_v57, %v2013_v60  ;;  %v3312_v57 = vld [vmem:[#allocation2] ss:$0 sm:$0xff] }
 0x1a4   :  { %2848 = vmatpush2.bf16.msra.mxu0 %v3307_v36  ;;  %2891 = vmatpush2.bf16.msra.mxu1 %v3309_v5  ;;  %v3267_v36 = vcombine.low %v2017_v42, %v2021_v44  ;;  %v3269_v5 = vcombine.low %v2018_v45, %v2022_v46  ;;  %v2079_v42 = vsub.s32 3, %v3948_v11 }
 0x1a5   :  { %2849 = vmatprep.subr.bf16.mxu0 %v3300_v38  ;;  %2892 = vmatprep.subr.bf16.mxu1 %v3302_v6  ;;  %v1816_v38 = vadd.f32 %v3358_v51, %v1775_v49 }
 0x1a8   :  { %2850 = vmatpush2.bf16.msra.mxu0 %v3299_v26  ;;  %2893 = vmatpush2.bf16.msra.mxu1 %v3301_v29 }
 0x1a9   :  { %2851 = vmatprep.subr.bf16.mxu0 %v3292_v31  ;;  %2894 = vmatprep.subr.bf16.mxu1 %v3294_v32  ;;  %v2005_v31 = vld [vmem:[#allocation5 + $0x230] sm:$0xff]  ;;  %v2006_v32 = vld [vmem:[#allocation5 + $0x238] sm:$0xff] }
 0x1aa   :  { %v3251_v30 = vcombine.low %v2001_v23, %v2005_v31  ;;  %v3253_v33 = vcombine.low %v2002_v2, %v2006_v32 }
 0x1ac   :  { %2852 = vmatpush2.bf16.msra.mxu0 %v3291_v24  ;;  %2895 = vmatpush2.bf16.msra.mxu1 %v3293_v18 }
 0x1ad   :  { %2853 = vmatprep.subr.bf16.mxu0 %v3284_v20  ;;  %2896 = vmatprep.subr.bf16.mxu1 %v3286_v53  ;;  %v3252_v20 = vcombine.high %v2001_v23, %v2005_v31  ;;  %v3254_v53 = vcombine.high %v2002_v2, %v2006_v32 }
 0x1b0   :  { %2854 = vmatpush2.bf16.msra.mxu0 %v3283_v37  ;;  %2897 = vmatpush2.bf16.msra.mxu1 %v3285_v39 }
 0x1b1   :  { %v3400_v54 = vpop.f32.mrf.mxu1  ;;  %v3378_v55 = vpop.f32.mrf.mxu0  ;;  %2855 = vmatprep.subr.bf16.mxu0 %v3276_v40  ;;  %2898 = vmatprep.subr.bf16.mxu1 %v3278_v41  ;;  %v2063_v41 = vld [vmem:[%s4054_s6] sm:$0xff] }
 0x1b2   :  { %v2068_v43 = vrot.slane %v2063_v41, %v1908_v19  ;;  %v2076_v44 = vrot.slane %v2063_v41, %v1916_v1  ;;  %v2072_v45 = vrot.slane %v2063_v41, %v1912_v25  ;;  %v2080_v46 = vrot.slane %v2063_v41, %v2079_v42 }
 0x1b3   :  { %v3401_v58 = vpop.f32.mrf.mxu1  ;;  %v3379_v4 = vpop.f32.mrf.mxu0 }
 0x1b4   :  { %v3380_v6 = vadd.f32 %v3379_v4, %v3378_v55  ;;  %2856 = vmatpush2.bf16.msra.mxu0 %v3275_v48  ;;  %2899 = vmatpush2.bf16.msra.mxu1 %v3277_v52  ;;  %v3402_v7 = vadd.f32 %v3401_v58, %v3400_v54 }
 0x1b5   :  { %v3403_v8 = vpop.f32.mrf.mxu1  ;;  %v3381_v9 = vpop.f32.mrf.mxu0  ;;  %2857 = vmatprep.subr.bf16.mxu0 %v3268_v0  ;;  %2900 = vmatprep.subr.bf16.mxu1 %v3270_v61 }
 0x1b6   :  { %v1857_v26 = vadd.f32 %v3380_v6, %v1816_v38  ;;  %v2087_v38 = vsub.s32 5, %v3948_v11  ;;  %v2095_v6 = vsub.s32 7, %v3948_v11 }
 0x1b7   :  { %v3404_v29 = vpop.f32.mrf.mxu1  ;;  %v3382_v14 = vpop.f32.mrf.mxu0 }
 0x1b8   :  { %v1898_v17 = vadd.f32 %v3402_v7, %v1857_v26  ;;  %v3383_v24 = vadd.f32 %v3382_v14, %v3381_v9  ;;  %2858 = vmatpush2.bf16.msra.mxu0 %v3267_v36  ;;  %2901 = vmatpush2.bf16.msra.mxu1 %v3269_v5  ;;  %v3405_v18 = vadd.f32 %v3404_v29, %v3403_v8  ;;  %v2083_v36 = vsub.s32 4, %v3948_v11 }
 0x1b9   :  { %2859 = vmatprep.subr.bf16.mxu0 %v3260_v10  ;;  %2902 = vmatprep.subr.bf16.mxu1 %v3262_v22  ;;  %v2091_v5 = vsub.s32 6, %v3948_v11  ;;  %v2088_v9 = vrot.slane %v2063_v41, %v2087_v38  ;;  %v2096_v10 = vrot.slane %v2063_v41, %v2095_v6 }
 0x1ba   :  { %v1860_v50 = vadd.f32 %v3383_v24, %v1819_v13  ;;  %v1923_v27 = vadd.f32 %v1917_v12, %v1898_v17  ;;  %v2084_v7 = vrot.slane %v2063_v41, %v2083_v36 }
 0x1bb   :  { %v2092_v8 = vrot.slane %v2063_v41, %v2091_v5 }
 0x1bc   :  { %v1901_v21 = vadd.f32 %v3405_v18, %v1860_v50  ;;  %2860 = vmatpush2.bf16.msra.mxu0 %v3259_v15  ;;  %2903 = vmatpush2.bf16.msra.mxu1 %v3261_v16  ;;  %v1929_v34 = vmax.f32 %v1923_v27, 0.0 }
 0x1bd   :  { %2861 = vmatprep.subr.bf16.mxu0 %v3252_v20  ;;  %2904 = vmatprep.subr.bf16.mxu1 %v3254_v53 }
 0x1be   :  { %v2940_v35 = vmul.f32 %v3311_v28, %v1929_v34  ;;  %v1926_v37 = vadd.f32 %v1917_v12, %v1901_v21 }
 0x1c0   :  { %2862 = vmatpush2.bf16.msra.mxu0 %v3251_v30  ;;  %2905 = vmatpush2.bf16.msra.mxu1 %v3253_v33  ;;  %v1932_v39 = vmax.f32 %v1926_v37, 0.0 }
 0x1c1   :  { %2942 = vadd.xlane.f32.xlu0 %v2940_v35 }
 0x1c2   :  { %v2941_v40 = vmul.f32 %v3311_v28, %v1932_v39 }
 0x1c3   :  { %2864 = vmatmul.mubr.bf16.vlgmr.msra.gmra.mxu0 %v3963_v59  ;;  %2907 = vmatmul.mubr.bf16.vlgmr.msra.gmra.mxu1 %v3963_v59 }
 0x1c5   :  { %2944 = vadd.xlane.f32.xlu0 %v2941_v40 }
 0x243   :  { %v2779_v47 = vpop.f32.mrf.mxu0  ;;  %v2822_v48 = vpop.f32.mrf.mxu1 }
 0x244   :  { %v2780_v49 = vadd.f32 %v2779_v47, %v2068_v43  ;;  %v2823_v51 = vadd.f32 %v2822_v48, %v2076_v44 }
 0x245   :  { %v2781_v59 = vpop.f32.mrf.mxu0  ;;  %v2824_v52 = vpop.f32.mrf.mxu1 }
 0x246   :  { %2917 = vst [vmem:[%s4057_s9] sm:$0xff] %v2780_v49  ;;  %2919 = vst [vmem:[%s4057_s9 + $0x10] sm:$0xff] %v2823_v51  ;;  %v2782_v19 = vadd.f32 %v2781_v59, %v2072_v45  ;;  %v2825_v54 = vadd.f32 %v2824_v52, %v2080_v46 }
 0x247   :  { %v2783_v55 = vpop.f32.mrf.mxu0  ;;  %v2826_v0 = vpop.f32.mrf.mxu1 }
 0x248   :  { %2918 = vst [vmem:[%s4057_s9 + $0x8] sm:$0xff] %v2782_v19  ;;  %2920 = vst [vmem:[%s4057_s9 + $0x18] sm:$0xff] %v2825_v54  ;;  %v2784_v25 = vadd.f32 %v2783_v55, %v2068_v43  ;;  %v2827_v61 = vadd.f32 %v2826_v0, %v2076_v44 }
 0x249   :  { %v2785_v58 = vpop.f32.mrf.mxu0  ;;  %v2828_v60 = vpop.f32.mrf.mxu1 }
 0x24a   :  { %2925 = vst [vmem:[%s4057_s9 + $0x40] sm:$0xff] %v2784_v25  ;;  %2927 = vst [vmem:[%s4057_s9 + $0x50] sm:$0xff] %v2827_v61  ;;  %v2943_v62 = vpop.xlane.xlu0 %2942  ;;  %v2786_v63 = vadd.f32 %v2785_v58, %v2072_v45  ;;  %v2829_v1 = vadd.f32 %v2828_v60, %v2080_v46 }
 0x24b   :  { %v2953_v3 = vadd.f32 %v3312_v57, %v2943_v62 }
 0x24c   :  { %2926 = vst [vmem:[%s4057_s9 + $0x48] sm:$0xff] %v2786_v63  ;;  %2928 = vst [vmem:[%s4057_s9 + $0x58] sm:$0xff] %v2829_v1 }
 0x24d   :  { %2956 = vst.msk [vmem:[%s4058_s10] sm:$0xff] %vm2955_vm2, %v2953_v3 }
 0x24e   :  { %v2945_v56 = vpop.xlane.xlu0 %2944 }
 0x24f   :  { %v2954_v4 = vadd.f32 %v3312_v57, %v2945_v56 }
 0x251   :  { %2957 = vst.msk [vmem:[%s4058_s10 + $0x8] sm:$0xff] %vm2955_vm2, %v2954_v4 }
 0x283   :  { %v2865_v22 = vpop.f32.mrf.mxu0  ;;  %v2908_v23 = vpop.f32.mrf.mxu1 }
 0x284   :  { %v2866_v26 = vadd.f32 %v2865_v22, %v2084_v7  ;;  %v2909_v29 = vadd.f32 %v2908_v23, %v2092_v8 }
 0x285   :  { %v2867_v31 = vpop.f32.mrf.mxu0  ;;  %v2910_v2 = vpop.f32.mrf.mxu1 }
 0x286   :  { %2921 = vst [vmem:[%s4057_s9 + $0x20] sm:$0xff] %v2866_v26  ;;  %2923 = vst [vmem:[%s4057_s9 + $0x30] sm:$0xff] %v2909_v29  ;;  %v2868_v32 = vadd.f32 %v2867_v31, %v2088_v9  ;;  %v2911_v11 = vadd.f32 %v2910_v2, %v2096_v10 }
 0x287   :  { %v2869_v12 = vpop.f32.mrf.mxu0  ;;  %v2912_v13 = vpop.f32.mrf.mxu1 }
 0x288   :  { %2922 = vst [vmem:[%s4057_s9 + $0x28] sm:$0xff] %v2868_v32  ;;  %2924 = vst [vmem:[%s4057_s9 + $0x38] sm:$0xff] %v2911_v11  ;;  %v2870_v14 = vadd.f32 %v2869_v12, %v2084_v7  ;;  %v2913_v15 = vadd.f32 %v2912_v13, %v2092_v8 }
 0x289   :  { %v2871_v16 = vpop.f32.mrf.mxu0  ;;  %v2914_v17 = vpop.f32.mrf.mxu1 }
 0x28a   :  { %2929 = vst [vmem:[%s4057_s9 + $0x60] sm:$0xff] %v2870_v14  ;;  %2931 = vst [vmem:[%s4057_s9 + $0x70] sm:$0xff] %v2913_v15  ;;  %v2872_v24 = vadd.f32 %v2871_v16, %v2088_v9  ;;  %v2915_v18 = vadd.f32 %v2914_v17, %v2096_v10 }
 0x28c   :  { %2930 = vst [vmem:[%s4057_s9 + $0x68] sm:$0xff] %v2872_v24  ;;  %2932 = vst [vmem:[%s4057_s9 + $0x78] sm:$0xff] %v2915_v18 }
 0x28d   :  { %2966 = vsyncpa [#allocation4], 1 }
 0x28e   :  { %2967 = vsyncpa [#allocation6], 1 }

</bundles_post_ra>
